<compile_context>
chip_gen: v7x
topology: tpu7x:2x2x1
jax: 0.10.0
libtpu: 0.0.40
codegen_flags: <defaults>
</compile_context>

<pallas_src>
import functools

import jax
import jax.numpy as jnp
from jax import lax
from jax.experimental import pallas as pl
from jax.experimental.pallas import tpu as pltpu


def _round_up(x, m):
    return ((x + m - 1) // m) * m


# ------------------------------ Pallas kernel ------------------------------ #
def decode_kernel(tgt_ref, tf_ref,                       # scalar prefetch (SMEM)
                  h0_ref, enc_ref, encp_ref, wah_ref, wslab_ref, bias_ref,  # inputs
                  dec_ref, hstate_ref,                   # outputs
                  onehot_ref,                            # VMEM scratch (carry)
                  *, sos_token, vocab):
    f32, bf16 = jnp.float32, jnp.bfloat16
    t = pl.program_id(0)

    Bp, Hp = h0_ref.shape
    _, S, De = enc_ref.shape
    Hdp = wah_ref.shape[1]
    Vp = onehot_ref.shape[1]
    G3 = wslab_ref.shape[1] - Vp          # 3 * Hp (GRU gate columns)

    col = lax.broadcasted_iota(jnp.int32, (Bp, Vp), 1)
    row = lax.broadcasted_iota(jnp.int32, (Bp, Vp), 0)

    # ---- step 0: initialize carries (hidden from encoder, SOS one-hot) ----
    @pl.when(t == 0)
    def _():
        hstate_ref[...] = h0_ref[...]
        onehot_ref[...] = (col == sos_token).astype(f32)

    h = hstate_ref[...]                   # (Bp, Hp) f32, pad lanes exactly 0
    h_b = h.astype(bf16)
    onehot_b = onehot_ref[...].astype(bf16)

    # ---------------- Bahdanau attention (enc projection hoisted) ----------
    h_part = jnp.dot(h_b, wah_ref[...], preferred_element_type=f32)        # (Bp, Hdp)
    energy = jnp.tanh(encp_ref[...] + h_part[:, None, :])                  # (Bp, S, Hdp)
    v_attn = bias_ref[0:1, 0:Hdp]                                          # (1, Hdp)
    scores = jnp.sum(energy * v_attn[None, :, :], axis=-1)                 # (Bp, S)
    scores = scores - jnp.max(scores, axis=-1, keepdims=True)
    ew = jnp.exp(scores)
    # approx reciprocal on the EUP: attn sums to 1 within ~2^-12 (documented)
    attn = ew * pl.reciprocal(jnp.sum(ew, axis=-1, keepdims=True), approx=True)
    ctx = jnp.sum(attn[:, :, None] * enc_ref[...].astype(f32), axis=1)     # (Bp, De)
    ctx_b = ctx.astype(bf16)

    # ---- fused (embedding-folded) GRU gates + fc projection ----
    # slab rows: [0:Vp]=embedding-folded token block, [Vp:Vp+De]=ctx block,
    #            [Vp+De:]=hidden block.  columns: [0:G3]=GRU gates, [G3:]=fc.
    p_tok = jnp.dot(onehot_b, wslab_ref[0:Vp, :], preferred_element_type=f32)       # (Bp, G3+Vp)
    p_ctx = jnp.dot(ctx_b, wslab_ref[Vp:Vp + De, :], preferred_element_type=f32)    # (Bp, G3+Vp)
    gh = jnp.dot(h_b, wslab_ref[Vp + De:, 0:G3], preferred_element_type=f32)        # (Bp, G3)

    b_ih = bias_ref[1:2, 0:G3]
    b_hh = bias_ref[2:3, 0:G3]
    b_fc = bias_ref[3:4, 0:Vp]

    gi = p_tok[:, 0:G3] + p_ctx[:, 0:G3] + b_ih
    gh = gh + b_hh
    r = jax.nn.sigmoid(gi[:, 0:Hp] + gh[:, 0:Hp])
    z = jax.nn.sigmoid(gi[:, Hp:2 * Hp] + gh[:, Hp:2 * Hp])
    n = jnp.tanh(gi[:, 2 * Hp:G3] + r * gh[:, 2 * Hp:G3])
    h_new = (1.0 - z) * n + z * h
    # (pad lanes: gi=gh=0 -> r=z=0.5, n=0 -> h_new pad lanes stay exactly 0)

    fc = (p_tok[:, G3:] + p_ctx[:, G3:]
          + jnp.dot(h_new.astype(bf16), wslab_ref[Vp + De:, G3:],
                    preferred_element_type=f32)
          + b_fc)                                                                   # (Bp, Vp)

    dec_ref[0] = fc                       # lane/sublane-dense (Bp, Vp) store
    hstate_ref[...] = h_new               # resident carry; written to HBM at end

    # ---- next-step input token: teacher forcing vs. in-kernel greedy argmax ----
    valid = col < vocab
    masked = jnp.where(valid, fc, jnp.float32(-1e30))
    mx = jnp.max(masked, axis=-1, keepdims=True)
    first_max = jnp.min(jnp.where(jnp.logical_and(masked == mx, valid), col, Vp),
                        axis=-1, keepdims=True)                                     # (Bp, 1)
    greedy_oh = (col == first_max).astype(f32)

    tf_oh = jnp.zeros((Bp, Vp), f32)
    for b in range(Bp):                   # static tiny loop; SMEM token ids -> one-hot rows
        tf_oh = tf_oh + jnp.where(
            jnp.logical_and(row == b, col == tgt_ref[t, b]), 1.0, 0.0)

    u = (tf_ref[t] != 0).astype(f32)      # scalar teacher-forcing flag for this step
    onehot_ref[...] = u * tf_oh + (1.0 - u) * greedy_oh


# ----------------- one-time parameter preprocessing (hoisted) -------------- #
def prepare_params(params):
    """Transpose / split / zero-pad / fold / bf16-cast PyTorch-shaped params ONCE."""
    f32, bf16 = jnp.float32, jnp.bfloat16
    V, E = params["embed"].shape
    H = params["gru_w_hh"].shape[1]
    De = params["gru_w_ih"].shape[1] - E          # gru input = cat(embedded, context)
    Hd = params["attn_w"].shape[0]

    Hp = _round_up(H, 128)
    Hdp = _round_up(Hd, 128)
    Vp = _round_up(V, 128)
    G3 = 3 * Hp
    W = max(G3, Hdp, Vp)                          # bias slab width (robust to Hd > 3H)

    def pad2(x, r, c):
        x = jnp.asarray(x, f32)
        return jnp.zeros((r, c), f32).at[:x.shape[0], :x.shape[1]].set(x)

    # --- attention: Linear(H + De -> Hd), cat order = (hidden, enc_out) ---
    wa_t = params["attn_w"].T.astype(f32)                        # (H+De, Hd)
    w_attn_h = pad2(wa_t[:H], Hp, Hdp).astype(bf16)              # (Hp, Hdp)  in-kernel
    wa_enc = pad2(wa_t[H:], De, Hdp)                             # (De, Hdp)  host precompute
    b_attn = pad2(params["attn_b"].reshape(1, -1), 1, Hdp)       # (1, Hdp)   host precompute

    # --- GRU (PyTorch gate order r,z,n) + fc, packed into one slab ---
    wih_t = params["gru_w_ih"].T.astype(f32)                     # (E+De, 3H)
    whh_t = params["gru_w_hh"].T.astype(f32)                     # (H, 3H)
    wfc_t = params["fc_w"].T.astype(f32)                         # (E+De+H, V)

    def pad_gates(w):                                            # (rows, 3H) -> (rows, 3Hp)
        return jnp.concatenate(
            [pad2(w[:, g * H:(g + 1) * H], w.shape[0], Hp) for g in range(3)], axis=1)

    # embedding-folded token rows: onehot @ (embed @ W_emb_rows)
    row_emb = jnp.concatenate([pad_gates(wih_t[:E]), pad2(wfc_t[:E], E, Vp)], axis=1)        # (E, G3+Vp)
    row_tok = pad2(params["embed"].astype(f32) @ row_emb, Vp, G3 + Vp)                       # (Vp, G3+Vp)
    row_ctx = jnp.concatenate([pad_gates(wih_t[E:E + De]),
                               pad2(wfc_t[E:E + De], De, Vp)], axis=1)                       # (De, G3+Vp)
    row_h = jnp.concatenate([pad2(pad_gates(whh_t), Hp, G3),
                             pad2(wfc_t[E + De:], Hp, Vp)], axis=1)                          # (Hp, G3+Vp)
    # bf16 packs 2 rows / sublane -> keep row-block offsets multiples of 16
    assert Vp % 16 == 0 and (Vp + De) % 16 == 0, "pad ctx row block to a multiple of 16"
    w_slab = jnp.concatenate([row_tok, row_ctx, row_h], axis=0).astype(bf16)                 # (Vp+De+Hp, G3+Vp)

    # --- bias slab (f32): rows = [attn_v, gru_b_ih, gru_b_hh, fc_b] ---
    biases = jnp.zeros((8, W), f32)
    biases = biases.at[0, :Hdp].set(pad2(params["attn_v"].reshape(1, -1), 1, Hdp)[0])
    biases = biases.at[1, :G3].set(pad_gates(params["gru_b_ih"].reshape(1, -1))[0])
    biases = biases.at[2, :G3].set(pad_gates(params["gru_b_hh"].reshape(1, -1))[0])
    biases = biases.at[3, :Vp].set(pad2(params["fc_b"].reshape(1, -1), 1, Vp)[0])

    weights = {"w_attn_h": w_attn_h, "wa_enc": wa_enc, "b_attn": b_attn,
               "w_slab": w_slab, "biases": biases}
    dims = {"V": V, "E": E, "H": H, "De": De, "Hp": Hp, "Hdp": Hdp, "Vp": Vp, "G3": G3}
    return weights, dims


# --------------------------- full-decode wrapper --------------------------- #
def seq2seq_decode(weights, tgt_ids, tf_flags, h0, encoder_outputs, *, dims, sos_token=1):
    """Runs the entire decode loop (T steps) in one pallas_call.
    tgt_ids: (T, B) int32 teacher tokens; tf_flags: (T,) int (1=teacher forcing);
    h0: (B, H) f32 decoder initial hidden; encoder_outputs: (S, B, De) f32."""
    f32, bf16 = jnp.float32, jnp.bfloat16
    V, H, De = dims["V"], dims["H"], dims["De"]
    Hp, Hdp, Vp, G3 = dims["Hp"], dims["Hdp"], dims["Vp"], dims["G3"]
    T, B = tgt_ids.shape
    S = encoder_outputs.shape[0]
    Bp = max(_round_up(B, 8), 8)                       # full-sublane MXU / store occupancy

    # -------- per-sequence (decode-invariant) host-side precompute --------
    enc_bsd = jnp.transpose(encoder_outputs, (1, 0, 2)).astype(f32)          # (B, S, De)
    enc_pad = jnp.zeros((Bp, S, De), f32).at[:B].set(enc_bsd)
    enc_proj = (enc_pad.reshape(Bp * S, De) @ weights["wa_enc"]
                + weights["b_attn"]).reshape(Bp, S, Hdp)                      # (Bp, S, Hdp) f32
    enc_b = enc_pad.astype(bf16)

    h0_pad = jnp.zeros((Bp, Hp), f32).at[:B, :H].set(h0.astype(f32))
    tgt_pad = jnp.zeros((T, Bp), jnp.int32).at[:, :B].set(tgt_ids.astype(jnp.int32))
    tf_i32 = tf_flags.astype(jnp.int32)

    NR = weights["w_slab"].shape[0]
    Wb = weights["biases"].shape[1]

    kernel = functools.partial(decode_kernel, sos_token=sos_token, vocab=V)

    dec_outs, h_fin = pl.pallas_call(
        kernel,
        out_shape=(jax.ShapeDtypeStruct((T, Bp, Vp), f32),
                   jax.ShapeDtypeStruct((Bp, Hp), f32)),
        grid_spec=pltpu.PrefetchScalarGridSpec(
            num_scalar_prefetch=2,
            grid=(T,),
            in_specs=[
                # constant index_maps: DMA'd once, stay VMEM-resident across all T steps
                pl.BlockSpec((Bp, Hp), lambda t, *_: (0, 0)),           # h0
                pl.BlockSpec((Bp, S, De), lambda t, *_: (0, 0, 0)),     # enc (bf16)
                pl.BlockSpec((Bp, S, Hdp), lambda t, *_: (0, 0, 0)),    # enc_proj (f32)
                pl.BlockSpec((Hp, Hdp), lambda t, *_: (0, 0)),          # attention W_h
                pl.BlockSpec((NR, G3 + Vp), lambda t, *_: (0, 0)),      # GRU+fc (+embed) slab
                pl.BlockSpec((8, Wb), lambda t, *_: (0, 0)),            # bias slab
            ],
            out_specs=(
                pl.BlockSpec((1, Bp, Vp), lambda t, *_: (t, 0, 0)),     # per-step logits
                pl.BlockSpec((Bp, Hp), lambda t, *_: (0, 0)),           # resident hidden carry
            ),
            scratch_shapes=[pltpu.VMEM((Bp, Vp), jnp.float32)],         # next-token one-hot
        ),
        compiler_params=pltpu.CompilerParams(dimension_semantics=("arbitrary",)),
    )(tgt_pad, tf_i32, h0_pad, enc_b, enc_proj,
      weights["w_attn_h"], weights["w_slab"], weights["biases"])

    return dec_outs[:, :B, :V], h_fin[:B, :H]


# ------------------------- pure-JAX f32 reference -------------------------- #
def reference_step(params, input_ids, last_hidden, encoder_outputs):
    """Pure-jnp replica of one PyTorch decoder step (eval mode, f32)."""
    f32 = jnp.float32
    H = last_hidden.shape[1]
    emb = params["embed"][input_ids].astype(f32)
    enc = jnp.transpose(encoder_outputs, (1, 0, 2)).astype(f32)
    S = enc.shape[1]
    hid_rep = jnp.repeat(last_hidden[:, None, :], S, axis=1)
    cat = jnp.concatenate([hid_rep, enc], axis=-1)
    energy = jnp.tanh(cat @ params["attn_w"].T + params["attn_b"])
    scores = jnp.einsum("bsh,h->bs", energy, params["attn_v"][0])
    aw = jax.nn.softmax(scores, axis=1)
    ctx = jnp.einsum("bs,bsd->bd", aw, enc)
    x = jnp.concatenate([emb, ctx], axis=1)
    gi = x @ params["gru_w_ih"].T + params["gru_b_ih"]
    gh = last_hidden @ params["gru_w_hh"].T + params["gru_b_hh"]
    r = jax.nn.sigmoid(gi[:, :H] + gh[:, :H])
    z = jax.nn.sigmoid(gi[:, H:2 * H] + gh[:, H:2 * H])
    n = jnp.tanh(gi[:, 2 * H:] + r * gh[:, 2 * H:])
    h_new = (1.0 - z) * n + z * last_hidden
    fc_in = jnp.concatenate([emb, ctx, h_new], axis=1)
    return fc_in @ params["fc_w"].T + params["fc_b"], h_new


def reference_seq2seq(params, tgt_ids, tf_flags, h0, encoder_outputs, sos_token=1):
    """Pure-jnp replica of Seq2SeqPack.forward with precomputed TF flags."""
    T, B = tgt_ids.shape
    dec_input = jnp.full((B,), sos_token, jnp.int32)
    h = h0
    outs = []
    for t in range(T):
        fc, h = reference_step(params, dec_input, h, encoder_outputs)
        outs.append(fc)
        topi = jnp.argmax(fc, axis=1).astype(jnp.int32)
        dec_input = jnp.where(tf_flags[t] != 0, tgt_ids[t], topi)
    return jnp.stack(outs, axis=0), h


if __name__ == "__main__":
    B, S, T = 2, 8, 6
    V, E, ENC_H, DEC_H = 16, 32, 32, 32            # output_size, embed_size, enc_hs, dec_hs
    De = 2 * ENC_H
    SOS = 1

    key = jax.random.PRNGKey(0)
    ks = jax.random.split(key, 14)

    def init(k, shape, scale=0.1):
        return scale * jax.random.normal(k, shape, jnp.float32)

    params = {
        "embed":    init(ks[0], (V, E)),
        "attn_w":   init(ks[1], (DEC_H, DEC_H + De)),    # Linear(dec_hs + 2*enc_hs -> dec_hs)
        "attn_b":   init(ks[2], (DEC_H,)),
        "attn_v":   init(ks[3], (1, DEC_H)),             # Linear(dec_hs -> 1, bias=False)
        "gru_w_ih": init(ks[4], (3 * DEC_H, E + De)),
        "gru_w_hh": init(ks[5], (3 * DEC_H, DEC_H)),
        "gru_b_ih": init(ks[6], (3 * DEC_H,)),
        "gru_b_hh": init(ks[7], (3 * DEC_H,)),
        "fc_w":     init(ks[8], (V, E + De + DEC_H)),
        "fc_b":     init(ks[9], (V,)),
    }

    h0 = init(ks[10], (B, DEC_H), scale=1.0)                      # encoder final hidden
    encoder_outputs = init(ks[11], (S, B, De), scale=1.0)         # encoder outputs (S, B, 2*enc_hs)
    tgt_ids = jax.random.randint(ks[12], (T, B), 0, V, dtype=jnp.int32)

    weights, dims = prepare_params(params)                        # hoisted, once per model
    decode = jax.jit(functools.partial(seq2seq_decode, dims=dims, sos_token=SOS))

    # ---- teacher-forced run: deterministic trajectory, full numeric check ----
    tf_on = jnp.ones((T,), jnp.int32)
    dec_tf, h_tf = decode(weights, tgt_ids, tf_on, h0, encoder_outputs)
    jax.block_until_ready((dec_tf, h_tf))
    ref_tf, ref_h_tf = reference_seq2seq(params, tgt_ids, tf_on, h0, encoder_outputs, SOS)
    assert dec_tf.shape == (T, B, V) and h_tf.shape == (B, DEC_H)
    # bf16 MXU operands vs. pure-f32 reference -> loose (but meaningful) tolerance
    assert jnp.allclose(dec_tf, ref_tf, atol=5e-2, rtol=5e-2)
    assert jnp.allclose(h_tf, ref_h_tf, atol=5e-2, rtol=5e-2)

    # ---- greedy run: exercises the in-kernel argmax feedback path ----
    tf_off = jnp.zeros((T,), jnp.int32)
    dec_gr, h_gr = decode(weights, tgt_ids, tf_off, h0, encoder_outputs)
    jax.block_until_ready((dec_gr, h_gr))
    assert bool(jnp.all(jnp.isfinite(dec_gr))) and bool(jnp.all(jnp.isfinite(h_gr)))
    # step 0 (SOS input) is flag-independent
    assert jnp.allclose(dec_gr[0], ref_tf[0], atol=5e-2, rtol=5e-2)
    # step 1 checked against a reference step re-driven with the kernel's OWN
    # step-0 argmax choice (robust to bf16-vs-f32 argmax tie flips)
    tok1 = jnp.argmax(dec_gr[0], axis=1).astype(jnp.int32)
    _, ref_h1 = reference_step(params, jnp.full((B,), SOS, jnp.int32), h0, encoder_outputs)
    ref_fc1, _ = reference_step(params, tok1, ref_h1, encoder_outputs)
    assert jnp.allclose(dec_gr[1], ref_fc1, atol=5e-2, rtol=5e-2)

    print("KERNEL_OK")
</pallas_src>

<mosaic_0001>
module attributes {stable_mosaic.version = 11 : i64} {
  func.func @decode_kernel(%arg0: i32, %arg1: memref<6x8xi32, #tpu.memory_space<smem>>, %arg2: memref<6xi32, #tpu.memory_space<smem>>, %arg3: memref<8x128xf32, #tpu.memory_space<vmem>>, %arg4: memref<8x8x64xbf16, #tpu.memory_space<vmem>>, %arg5: memref<8x8x128xf32, #tpu.memory_space<vmem>>, %arg6: memref<128x128xbf16, #tpu.memory_space<vmem>>, %arg7: memref<320x512xbf16, #tpu.memory_space<vmem>>, %arg8: memref<8x384xf32, #tpu.memory_space<vmem>>, %arg9: memref<1x8x128xf32, #tpu.memory_space<vmem>>, %arg10: memref<8x128xf32, #tpu.memory_space<vmem>>, %arg11: memref<8x128xf32, #tpu.memory_space<vmem>>) attributes {dimension_semantics = [#tpu.dimension_semantics<arbitrary>], iteration_bounds = array<i64: 6>, scalar_prefetch = 2 : i64, scratch_operands = 1 : i64, tpu.core_type = #tpu.core_type<tc>, window_params = [{pipeline_mode = #tpu.pipeline_mode<synchronous>, transform_indices = @transform_0, window_bounds = array<i64: 8, 128>}, {pipeline_mode = #tpu.pipeline_mode<synchronous>, transform_indices = @transform_1, window_bounds = array<i64: 8, 8, 64>}, {pipeline_mode = #tpu.pipeline_mode<synchronous>, transform_indices = @transform_2, window_bounds = array<i64: 8, 8, 128>}, {pipeline_mode = #tpu.pipeline_mode<synchronous>, transform_indices = @transform_3, window_bounds = array<i64: 128, 128>}, {pipeline_mode = #tpu.pipeline_mode<synchronous>, transform_indices = @transform_4, window_bounds = array<i64: 320, 512>}, {pipeline_mode = #tpu.pipeline_mode<synchronous>, transform_indices = @transform_5, window_bounds = array<i64: 8, 384>}, {transform_indices = @transform_6, window_bounds = array<i64: 1, 8, 128>}, {pipeline_mode = #tpu.pipeline_mode<synchronous>, transform_indices = @transform_7, window_bounds = array<i64: 8, 128>}]} {
    %0 = tpu.iota {dimensions = array<i32: 1>} : vector<8x128xi32>
    %1 = tpu.iota {dimensions = array<i32: 0>} : vector<8x128xi32>
    %c0_i32 = arith.constant 0 : i32
    %2 = arith.cmpi eq, %arg0, %c0_i32 : i32
    %3 = arith.extui %2 : i1 to i32
    %c0_i32_0 = arith.constant 0 : i32
    %4 = arith.cmpi ne, %3, %c0_i32_0 : i32
    scf.if %4 {
      %c0_67 = arith.constant 0 : index
      %c0_68 = arith.constant 0 : index
      %211 = vector.load %arg3[%c0_67, %c0_68] : memref<8x128xf32, #tpu.memory_space<vmem>>, vector<8x128xf32>
      %c0_69 = arith.constant 0 : index
      %c0_70 = arith.constant 0 : index
      %212 = vector.load %arg10[%c0_69, %c0_70] : memref<8x128xf32, #tpu.memory_space<vmem>>, vector<8x128xf32>
      tpu.vector_store %arg10[%c0_69, %c0_70], %211 {strides = array<i32>} : memref<8x128xf32, #tpu.memory_space<vmem>>, vector<8x128xf32>,
      %c1_i32_71 = arith.constant 1 : i32
      %213 = vector.broadcast %c1_i32_71 : i32 to vector<8x128xi32>
      %214 = arith.cmpi eq, %0, %213 : vector<8x128xi32>
      %215 = arith.extui %214 : vector<8x128xi1> to vector<8x128xi32>
      %216 = arith.sitofp %215 : vector<8x128xi32> to vector<8x128xf32>
      %c0_72 = arith.constant 0 : index
      %c0_73 = arith.constant 0 : index
      %217 = vector.load %arg11[%c0_72, %c0_73] : memref<8x128xf32, #tpu.memory_space<vmem>>, vector<8x128xf32>
      tpu.vector_store %arg11[%c0_72, %c0_73], %216 {strides = array<i32>} : memref<8x128xf32, #tpu.memory_space<vmem>>, vector<8x128xf32>,
    } else {
    }
    %c0 = arith.constant 0 : index
    %c0_1 = arith.constant 0 : index
    %5 = vector.load %arg10[%c0, %c0_1] : memref<8x128xf32, #tpu.memory_space<vmem>>, vector<8x128xf32>
    %6 = arith.truncf %5 : vector<8x128xf32> to vector<8x128xbf16>
    %c0_2 = arith.constant 0 : index
    %c0_3 = arith.constant 0 : index
    %7 = vector.load %arg11[%c0_2, %c0_3] : memref<8x128xf32, #tpu.memory_space<vmem>>, vector<8x128xf32>
    %8 = arith.truncf %7 : vector<8x128xf32> to vector<8x128xbf16>
    %c0_4 = arith.constant 0 : index
    %c0_5 = arith.constant 0 : index
    %9 = vector.load %arg6[%c0_4, %c0_5] : memref<128x128xbf16, #tpu.memory_space<vmem>>, vector<128x128xbf16>
    %cst = arith.constant dense<0.000000e+00> : vector<8x128xf32>
    %10 = tpu.matmul %6, %9, %cst {dimension_numbers = #tpu.dot_dimension_numbers<[1], [0], [0], [1], [0, 0, 1, 1], [], []>} : vector<8x128xbf16>, vector<128x128xbf16>, vector<8x128xf32> -> vector<8x128xf32>
    %c0_6 = arith.constant 0 : index
    %c0_7 = arith.constant 0 : index
    %c0_8 = arith.constant 0 : index
    %11 = vector.load %arg5[%c0_6, %c0_7, %c0_8] : memref<8x8x128xf32, #tpu.memory_space<vmem>>, vector<8x8x128xf32>
    %12 = vector.shape_cast %10 : vector<8x128xf32> to vector<8x1x128xf32>
    %13 = vector.broadcast %12 : vector<8x1x128xf32> to vector<8x8x128xf32>
    %14 = arith.addf %11, %13 : vector<8x8x128xf32>
    %15 = math.tanh %14 : vector<8x8x128xf32>
    %c0_9 = arith.constant 0 : index
    %c0_10 = arith.constant 0 : index
    %16 = vector.load %arg8[%c0_9, %c0_10] : memref<8x384xf32, #tpu.memory_space<vmem>>, vector<1x128xf32>
    %17 = vector.shape_cast %16 : vector<1x128xf32> to vector<1x1x128xf32>
    %18 = vector.broadcast %17 : vector<1x1x128xf32> to vector<8x8x128xf32>
    %19 = arith.mulf %15, %18 : vector<8x8x128xf32>
    %cst_11 = arith.constant dense<0.000000e+00> : vector<8x8xf32>
    %20 = vector.multi_reduction <add>, %19, %cst_11 [2] : vector<8x8x128xf32> to vector<8x8xf32>
    %cst_12 = arith.constant dense<0xFF800000> : vector<8xf32>
    %21 = vector.multi_reduction <maximumf>, %20, %cst_12 [1] : vector<8x8xf32> to vector<8xf32>
    %22 = vector.shape_cast %21 : vector<8xf32> to vector<8x1xf32>
    %23 = vector.broadcast %22 : vector<8x1xf32> to vector<8x8xf32>
    %24 = arith.subf %20, %23 : vector<8x8xf32>
    %25 = math.exp %24 : vector<8x8xf32>
    %cst_13 = arith.constant dense<0.000000e+00> : vector<8xf32>
    %26 = vector.multi_reduction <add>, %25, %cst_13 [1] : vector<8x8xf32> to vector<8xf32>
    %27 = vector.shape_cast %26 : vector<8xf32> to vector<8x1xf32>
    %28 = tpu.reciprocal %27 {approx = true} : vector<8x1xf32> -> vector<8x1xf32>
    %29 = vector.broadcast %28 : vector<8x1xf32> to vector<8x8xf32>
    %30 = arith.mulf %25, %29 : vector<8x8xf32>
    %31 = vector.shape_cast %30 : vector<8x8xf32> to vector<8x8x1xf32>
    %c0_14 = arith.constant 0 : index
    %c0_15 = arith.constant 0 : index
    %c0_16 = arith.constant 0 : index
    %32 = vector.load %arg4[%c0_14, %c0_15, %c0_16] : memref<8x8x64xbf16, #tpu.memory_space<vmem>>, vector<8x8x64xbf16>
    %33 = arith.extf %32 : vector<8x8x64xbf16> to vector<8x8x64xf32>
    %34 = vector.broadcast %31 : vector<8x8x1xf32> to vector<8x8x64xf32>
    %35 = arith.mulf %34, %33 : vector<8x8x64xf32>
    %cst_17 = arith.constant dense<0.000000e+00> : vector<8x64xf32>
    %36 = vector.multi_reduction <add>, %35, %cst_17 [1] : vector<8x8x64xf32> to vector<8x64xf32>
    %37 = arith.truncf %36 : vector<8x64xf32> to vector<8x64xbf16>
    %c0_18 = arith.constant 0 : index
    %c0_19 = arith.constant 0 : index
    %38 = vector.load %arg7[%c0_18, %c0_19] : memref<320x512xbf16, #tpu.memory_space<vmem>>, vector<128x512xbf16>
    %cst_20 = arith.constant dense<0.000000e+00> : vector<8x512xf32>
    %39 = tpu.matmul %8, %38, %cst_20 {dimension_numbers = #tpu.dot_dimension_numbers<[1], [0], [0], [1], [0, 0, 1, 1], [], []>} : vector<8x128xbf16>, vector<128x512xbf16>, vector<8x512xf32> -> vector<8x512xf32>
    %c128 = arith.constant 128 : index
    %c0_21 = arith.constant 0 : index
    %40 = vector.load %arg7[%c128, %c0_21] : memref<320x512xbf16, #tpu.memory_space<vmem>>, vector<64x512xbf16>
    %cst_22 = arith.constant dense<0.000000e+00> : vector<8x512xf32>
    %41 = tpu.matmul %37, %40, %cst_22 {dimension_numbers = #tpu.dot_dimension_numbers<[1], [0], [0], [1], [0, 0, 1, 1], [], []>} : vector<8x64xbf16>, vector<64x512xbf16>, vector<8x512xf32> -> vector<8x512xf32>
    %c192 = arith.constant 192 : index
    %c0_23 = arith.constant 0 : index
    %42 = vector.load %arg7[%c192, %c0_23] : memref<320x512xbf16, #tpu.memory_space<vmem>>, vector<128x384xbf16>
    %cst_24 = arith.constant dense<0.000000e+00> : vector<8x384xf32>
    %43 = tpu.matmul %6, %42, %cst_24 {dimension_numbers = #tpu.dot_dimension_numbers<[1], [0], [0], [1], [0, 0, 1, 1], [], []>} : vector<8x128xbf16>, vector<128x384xbf16>, vector<8x384xf32> -> vector<8x384xf32>
    %c1 = arith.constant 1 : index
    %c0_25 = arith.constant 0 : index
    %44 = vector.load %arg8[%c1, %c0_25] : memref<8x384xf32, #tpu.memory_space<vmem>>, vector<1x384xf32>
    %c2 = arith.constant 2 : index
    %c0_26 = arith.constant 0 : index
    %45 = vector.load %arg8[%c2, %c0_26] : memref<8x384xf32, #tpu.memory_space<vmem>>, vector<1x384xf32>
    %c3 = arith.constant 3 : index
    %c0_27 = arith.constant 0 : index
    %46 = vector.load %arg8[%c3, %c0_27] : memref<8x384xf32, #tpu.memory_space<vmem>>, vector<1x128xf32>
    %47 = vector.extract_strided_slice %39 {offsets = [0, 0], sizes = [8, 384], strides = [1, 1]} : vector<8x512xf32> to vector<8x384xf32>
    %48 = vector.extract_strided_slice %41 {offsets = [0, 0], sizes = [8, 384], strides = [1, 1]} : vector<8x512xf32> to vector<8x384xf32>
    %49 = arith.addf %47, %48 : vector<8x384xf32>
    %50 = vector.broadcast %44 : vector<1x384xf32> to vector<8x384xf32>
    %51 = arith.addf %49, %50 : vector<8x384xf32>
    %52 = vector.broadcast %45 : vector<1x384xf32> to vector<8x384xf32>
    %53 = arith.addf %43, %52 : vector<8x384xf32>
    %54 = vector.extract_strided_slice %51 {offsets = [0, 0], sizes = [8, 128], strides = [1, 1]} : vector<8x384xf32> to vector<8x128xf32>
    %55 = vector.extract_strided_slice %53 {offsets = [0, 0], sizes = [8, 128], strides = [1, 1]} : vector<8x384xf32> to vector<8x128xf32>
    %56 = arith.addf %54, %55 : vector<8x128xf32>
    %57 = arith.negf %56 : vector<8x128xf32>
    %58 = math.exp %57 : vector<8x128xf32>
    %cst_28 = arith.constant 1.000000e+00 : f32
    %59 = vector.broadcast %cst_28 : f32 to vector<8x128xf32>
    %60 = arith.addf %59, %58 : vector<8x128xf32>
    %61 = arith.divf %59, %60 : vector<8x128xf32>
    %62 = vector.extract_strided_slice %51 {offsets = [0, 128], sizes = [8, 128], strides = [1, 1]} : vector<8x384xf32> to vector<8x128xf32>
    %63 = vector.extract_strided_slice %53 {offsets = [0, 128], sizes = [8, 128], strides = [1, 1]} : vector<8x384xf32> to vector<8x128xf32>
    %64 = arith.addf %62, %63 : vector<8x128xf32>
    %65 = arith.negf %64 : vector<8x128xf32>
    %66 = math.exp %65 : vector<8x128xf32>
    %cst_29 = arith.constant 1.000000e+00 : f32
    %67 = vector.broadcast %cst_29 : f32 to vector<8x128xf32>
    %68 = arith.addf %67, %66 : vector<8x128xf32>
    %69 = arith.divf %67, %68 : vector<8x128xf32>
    %70 = vector.extract_strided_slice %51 {offsets = [0, 256], sizes = [8, 128], strides = [1, 1]} : vector<8x384xf32> to vector<8x128xf32>
    %71 = vector.extract_strided_slice %53 {offsets = [0, 256], sizes = [8, 128], strides = [1, 1]} : vector<8x384xf32> to vector<8x128xf32>
    %72 = arith.mulf %61, %71 : vector<8x128xf32>
    %73 = arith.addf %70, %72 : vector<8x128xf32>
    %74 = math.tanh %73 : vector<8x128xf32>
    %cst_30 = arith.constant 1.000000e+00 : f32
    %75 = vector.broadcast %cst_30 : f32 to vector<8x128xf32>
    %76 = arith.subf %75, %69 : vector<8x128xf32>
    %77 = arith.mulf %76, %74 : vector<8x128xf32>
    %78 = arith.mulf %69, %5 : vector<8x128xf32>
    %79 = arith.addf %77, %78 : vector<8x128xf32>
    %80 = vector.extract_strided_slice %39 {offsets = [0, 384], sizes = [8, 128], strides = [1, 1]} : vector<8x512xf32> to vector<8x128xf32>
    %81 = vector.extract_strided_slice %41 {offsets = [0, 384], sizes = [8, 128], strides = [1, 1]} : vector<8x512xf32> to vector<8x128xf32>
    %82 = arith.addf %80, %81 : vector<8x128xf32>
    %83 = arith.truncf %79 : vector<8x128xf32> to vector<8x128xbf16>
    %c192_31 = arith.constant 192 : index
    %c384 = arith.constant 384 : index
    %84 = vector.load %arg7[%c192_31, %c384] : memref<320x512xbf16, #tpu.memory_space<vmem>>, vector<128x128xbf16>
    %cst_32 = arith.constant dense<0.000000e+00> : vector<8x128xf32>
    %85 = tpu.matmul %83, %84, %cst_32 {dimension_numbers = #tpu.dot_dimension_numbers<[1], [0], [0], [1], [0, 0, 1, 1], [], []>} : vector<8x128xbf16>, vector<128x128xbf16>, vector<8x128xf32> -> vector<8x128xf32>
    %86 = arith.addf %82, %85 : vector<8x128xf32>
    %87 = vector.broadcast %46 : vector<1x128xf32> to vector<8x128xf32>
    %88 = arith.addf %86, %87 : vector<8x128xf32>
    %c0_33 = arith.constant 0 : index
    %c0_34 = arith.constant 0 : index
    %c0_35 = arith.constant 0 : index
    %89 = vector.load %arg9[%c0_33, %c0_34, %c0_35] : memref<1x8x128xf32, #tpu.memory_space<vmem>>, vector<1x8x128xf32>
    %90 = vector.shape_cast %89 : vector<1x8x128xf32> to vector<8x128xf32>
    %91 = vector.shape_cast %88 : vector<8x128xf32> to vector<1x8x128xf32>
    tpu.vector_store %arg9[%c0_33, %c0_34, %c0_35], %91 {strides = array<i32>} : memref<1x8x128xf32, #tpu.memory_space<vmem>>, vector<1x8x128xf32>,
    %c0_36 = arith.constant 0 : index
    %c0_37 = arith.constant 0 : index
    %92 = vector.load %arg10[%c0_36, %c0_37] : memref<8x128xf32, #tpu.memory_space<vmem>>, vector<8x128xf32>
    tpu.vector_store %arg10[%c0_36, %c0_37], %79 {strides = array<i32>} : memref<8x128xf32, #tpu.memory_space<vmem>>, vector<8x128xf32>,
    %c16_i32 = arith.constant 16 : i32
    %93 = vector.broadcast %c16_i32 : i32 to vector<8x128xi32>
    %94 = arith.cmpi slt, %0, %93 : vector<8x128xi32>
    %cst_38 = arith.constant -1.000000e+30 : f32
    %95 = vector.broadcast %cst_38 : f32 to vector<8x128xf32>
    %96 = arith.select %94, %88, %95 : vector<8x128xi1>, vector<8x128xf32>
    %cst_39 = arith.constant dense<0xFF800000> : vector<8xf32>
    %97 = vector.multi_reduction <maximumf>, %96, %cst_39 [1] : vector<8x128xf32> to vector<8xf32>
    %98 = vector.shape_cast %97 : vector<8xf32> to vector<8x1xf32>
    %99 = vector.broadcast %98 : vector<8x1xf32> to vector<8x128xf32>
    %100 = arith.cmpf oeq, %96, %99 : vector<8x128xf32>
    %101 = arith.andi %100, %94 : vector<8x128xi1>
    %c128_i32 = arith.constant 128 : i32
    %102 = vector.broadcast %c128_i32 : i32 to vector<8x128xi32>
    %103 = arith.select %101, %0, %102 : vector<8x128xi1>, vector<8x128xi32>
    %cst_40 = arith.constant dense<2147483647> : vector<8xi32>
    %104 = vector.multi_reduction <minsi>, %103, %cst_40 [1] : vector<8x128xi32> to vector<8xi32>
    %105 = vector.shape_cast %104 : vector<8xi32> to vector<8x1xi32>
    %106 = vector.broadcast %105 : vector<8x1xi32> to vector<8x128xi32>
    %107 = arith.cmpi eq, %0, %106 : vector<8x128xi32>
    %108 = arith.extui %107 : vector<8x128xi1> to vector<8x128xi32>
    %109 = arith.sitofp %108 : vector<8x128xi32> to vector<8x128xf32>
    %cst_41 = arith.constant 0.000000e+00 : f32
    %110 = vector.broadcast %cst_41 : f32 to vector<8x128xf32>
    %c0_i32_42 = arith.constant 0 : i32
    %111 = vector.broadcast %c0_i32_42 : i32 to vector<8x128xi32>
    %112 = arith.cmpi eq, %1, %111 : vector<8x128xi32>
    %113 = arith.index_cast %arg0 : i32 to index
    %c0_43 = arith.constant 0 : index
    %114 = memref.load %arg1[%113, %c0_43] : memref<6x8xi32, #tpu.memory_space<smem>>
    %115 = vector.broadcast %114 : i32 to vector<8x128xi32>
    %116 = arith.cmpi eq, %0, %115 : vector<8x128xi32>
    %117 = arith.andi %112, %116 : vector<8x128xi1>
    %cst_44 = arith.constant 1.000000e+00 : f32
    %cst_45 = arith.constant 0.000000e+00 : f32
    %118 = vector.broadcast %cst_44 : f32 to vector<8x128xf32>
    %119 = vector.broadcast %cst_45 : f32 to vector<8x128xf32>
    %120 = arith.select %117, %118, %119 : vector<8x128xi1>, vector<8x128xf32>
    %121 = arith.addf %110, %120 : vector<8x128xf32>
    %c1_i32 = arith.constant 1 : i32
    %122 = vector.broadcast %c1_i32 : i32 to vector<8x128xi32>
    %123 = arith.cmpi eq, %1, %122 : vector<8x128xi32>
    %124 = arith.index_cast %arg0 : i32 to index
    %c1_46 = arith.constant 1 : index
    %125 = memref.load %arg1[%124, %c1_46] : memref<6x8xi32, #tpu.memory_space<smem>>
    %126 = vector.broadcast %125 : i32 to vector<8x128xi32>
    %127 = arith.cmpi eq, %0, %126 : vector<8x128xi32>
    %128 = arith.andi %123, %127 : vector<8x128xi1>
    %cst_47 = arith.constant 1.000000e+00 : f32
    %cst_48 = arith.constant 0.000000e+00 : f32
    %129 = vector.broadcast %cst_47 : f32 to vector<8x128xf32>
    %130 = vector.broadcast %cst_48 : f32 to vector<8x128xf32>
    %131 = arith.select %128, %129, %130 : vector<8x128xi1>, vector<8x128xf32>
    %132 = arith.addf %121, %131 : vector<8x128xf32>
    %c2_i32 = arith.constant 2 : i32
    %133 = vector.broadcast %c2_i32 : i32 to vector<8x128xi32>
    %134 = arith.cmpi eq, %1, %133 : vector<8x128xi32>
    %135 = arith.index_cast %arg0 : i32 to index
    %c2_49 = arith.constant 2 : index
    %136 = memref.load %arg1[%135, %c2_49] : memref<6x8xi32, #tpu.memory_space<smem>>
    %137 = vector.broadcast %136 : i32 to vector<8x128xi32>
    %138 = arith.cmpi eq, %0, %137 : vector<8x128xi32>
    %139 = arith.andi %134, %138 : vector<8x128xi1>
    %cst_50 = arith.constant 1.000000e+00 : f32
    %cst_51 = arith.constant 0.000000e+00 : f32
    %140 = vector.broadcast %cst_50 : f32 to vector<8x128xf32>
    %141 = vector.broadcast %cst_51 : f32 to vector<8x128xf32>
    %142 = arith.select %139, %140, %141 : vector<8x128xi1>, vector<8x128xf32>
    %143 = arith.addf %132, %142 : vector<8x128xf32>
    %c3_i32 = arith.constant 3 : i32
    %144 = vector.broadcast %c3_i32 : i32 to vector<8x128xi32>
    %145 = arith.cmpi eq, %1, %144 : vector<8x128xi32>
    %146 = arith.index_cast %arg0 : i32 to index
    %c3_52 = arith.constant 3 : index
    %147 = memref.load %arg1[%146, %c3_52] : memref<6x8xi32, #tpu.memory_space<smem>>
    %148 = vector.broadcast %147 : i32 to vector<8x128xi32>
    %149 = arith.cmpi eq, %0, %148 : vector<8x128xi32>
    %150 = arith.andi %145, %149 : vector<8x128xi1>
    %cst_53 = arith.constant 1.000000e+00 : f32
    %cst_54 = arith.constant 0.000000e+00 : f32
    %151 = vector.broadcast %cst_53 : f32 to vector<8x128xf32>
    %152 = vector.broadcast %cst_54 : f32 to vector<8x128xf32>
    %153 = arith.select %150, %151, %152 : vector<8x128xi1>, vector<8x128xf32>
    %154 = arith.addf %143, %153 : vector<8x128xf32>
    %c4_i32 = arith.constant 4 : i32
    %155 = vector.broadcast %c4_i32 : i32 to vector<8x128xi32>
    %156 = arith.cmpi eq, %1, %155 : vector<8x128xi32>
    %157 = arith.index_cast %arg0 : i32 to index
    %c4 = arith.constant 4 : index
    %158 = memref.load %arg1[%157, %c4] : memref<6x8xi32, #tpu.memory_space<smem>>
    %159 = vector.broadcast %158 : i32 to vector<8x128xi32>
    %160 = arith.cmpi eq, %0, %159 : vector<8x128xi32>
    %161 = arith.andi %156, %160 : vector<8x128xi1>
    %cst_55 = arith.constant 1.000000e+00 : f32
    %cst_56 = arith.constant 0.000000e+00 : f32
    %162 = vector.broadcast %cst_55 : f32 to vector<8x128xf32>
    %163 = vector.broadcast %cst_56 : f32 to vector<8x128xf32>
    %164 = arith.select %161, %162, %163 : vector<8x128xi1>, vector<8x128xf32>
    %165 = arith.addf %154, %164 : vector<8x128xf32>
    %c5_i32 = arith.constant 5 : i32
    %166 = vector.broadcast %c5_i32 : i32 to vector<8x128xi32>
    %167 = arith.cmpi eq, %1, %166 : vector<8x128xi32>
    %168 = arith.index_cast %arg0 : i32 to index
    %c5 = arith.constant 5 : index
    %169 = memref.load %arg1[%168, %c5] : memref<6x8xi32, #tpu.memory_space<smem>>
    %170 = vector.broadcast %169 : i32 to vector<8x128xi32>
    %171 = arith.cmpi eq, %0, %170 : vector<8x128xi32>
    %172 = arith.andi %167, %171 : vector<8x128xi1>
    %cst_57 = arith.constant 1.000000e+00 : f32
    %cst_58 = arith.constant 0.000000e+00 : f32
    %173 = vector.broadcast %cst_57 : f32 to vector<8x128xf32>
    %174 = vector.broadcast %cst_58 : f32 to vector<8x128xf32>
    %175 = arith.select %172, %173, %174 : vector<8x128xi1>, vector<8x128xf32>
    %176 = arith.addf %165, %175 : vector<8x128xf32>
    %c6_i32 = arith.constant 6 : i32
    %177 = vector.broadcast %c6_i32 : i32 to vector<8x128xi32>
    %178 = arith.cmpi eq, %1, %177 : vector<8x128xi32>
    %179 = arith.index_cast %arg0 : i32 to index
    %c6 = arith.constant 6 : index
    %180 = memref.load %arg1[%179, %c6] : memref<6x8xi32, #tpu.memory_space<smem>>
    %181 = vector.broadcast %180 : i32 to vector<8x128xi32>
    %182 = arith.cmpi eq, %0, %181 : vector<8x128xi32>
    %183 = arith.andi %178, %182 : vector<8x128xi1>
    %cst_59 = arith.constant 1.000000e+00 : f32
    %cst_60 = arith.constant 0.000000e+00 : f32
    %184 = vector.broadcast %cst_59 : f32 to vector<8x128xf32>
    %185 = vector.broadcast %cst_60 : f32 to vector<8x128xf32>
    %186 = arith.select %183, %184, %185 : vector<8x128xi1>, vector<8x128xf32>
    %187 = arith.addf %176, %186 : vector<8x128xf32>
    %c7_i32 = arith.constant 7 : i32
    %188 = vector.broadcast %c7_i32 : i32 to vector<8x128xi32>
    %189 = arith.cmpi eq, %1, %188 : vector<8x128xi32>
    %190 = arith.index_cast %arg0 : i32 to index
    %c7 = arith.constant 7 : index
    %191 = memref.load %arg1[%190, %c7] : memref<6x8xi32, #tpu.memory_space<smem>>
    %192 = vector.broadcast %191 : i32 to vector<8x128xi32>
    %193 = arith.cmpi eq, %0, %192 : vector<8x128xi32>
    %194 = arith.andi %189, %193 : vector<8x128xi1>
    %cst_61 = arith.constant 1.000000e+00 : f32
    %cst_62 = arith.constant 0.000000e+00 : f32
    %195 = vector.broadcast %cst_61 : f32 to vector<8x128xf32>
    %196 = vector.broadcast %cst_62 : f32 to vector<8x128xf32>
    %197 = arith.select %194, %195, %196 : vector<8x128xi1>, vector<8x128xf32>
    %198 = arith.addf %187, %197 : vector<8x128xf32>
    %199 = arith.index_cast %arg0 : i32 to index
    %200 = memref.load %arg2[%199] : memref<6xi32, #tpu.memory_space<smem>>
    %c0_i32_63 = arith.constant 0 : i32
    %201 = arith.cmpi ne, %200, %c0_i32_63 : i32
    %202 = arith.extui %201 : i1 to i32
    %203 = arith.sitofp %202 : i32 to f32
    %204 = vector.broadcast %203 : f32 to vector<8x128xf32>
    %205 = arith.mulf %204, %198 : vector<8x128xf32>
    %cst_64 = arith.constant 1.000000e+00 : f32
    %206 = arith.subf %cst_64, %203 : f32
    %207 = vector.broadcast %206 : f32 to vector<8x128xf32>
    %208 = arith.mulf %207, %109 : vector<8x128xf32>
    %209 = arith.addf %205, %208 : vector<8x128xf32>
    %c0_65 = arith.constant 0 : index
    %c0_66 = arith.constant 0 : index
    %210 = vector.load %arg11[%c0_65, %c0_66] : memref<8x128xf32, #tpu.memory_space<vmem>>, vector<8x128xf32>
    tpu.vector_store %arg11[%c0_65, %c0_66], %209 {strides = array<i32>} : memref<8x128xf32, #tpu.memory_space<vmem>>, vector<8x128xf32>,
    return
  }
  func.func @transform_0(%arg0: i32, %arg1: memref<6x8xi32, #tpu.memory_space<smem>>, %arg2: memref<6xi32, #tpu.memory_space<smem>>) -> (i32, i32) {
    %c0_i32 = arith.constant 0 : i32
    %c0_i32_0 = arith.constant 0 : i32
    %c0_i32_1 = arith.constant 0 : i32
    return %c0_i32, %c0_i32_0 : i32, i32
  }
  func.func @transform_1(%arg0: i32, %arg1: memref<6x8xi32, #tpu.memory_space<smem>>, %arg2: memref<6xi32, #tpu.memory_space<smem>>) -> (i32, i32, i32) {
    %c0_i32 = arith.constant 0 : i32
    %c0_i32_0 = arith.constant 0 : i32
    %c0_i32_1 = arith.constant 0 : i32
    %c0_i32_2 = arith.constant 0 : i32
    return %c0_i32, %c0_i32_0, %c0_i32_1 : i32, i32, i32
  }
  func.func @transform_2(%arg0: i32, %arg1: memref<6x8xi32, #tpu.memory_space<smem>>, %arg2: memref<6xi32, #tpu.memory_space<smem>>) -> (i32, i32, i32) {
    %c0_i32 = arith.constant 0 : i32
    %c0_i32_0 = arith.constant 0 : i32
    %c0_i32_1 = arith.constant 0 : i32
    %c0_i32_2 = arith.constant 0 : i32
    return %c0_i32, %c0_i32_0, %c0_i32_1 : i32, i32, i32
  }
  func.func @transform_3(%arg0: i32, %arg1: memref<6x8xi32, #tpu.memory_space<smem>>, %arg2: memref<6xi32, #tpu.memory_space<smem>>) -> (i32, i32) {
    %c0_i32 = arith.constant 0 : i32
    %c0_i32_0 = arith.constant 0 : i32
    %c0_i32_1 = arith.constant 0 : i32
    return %c0_i32, %c0_i32_0 : i32, i32
  }
  func.func @transform_4(%arg0: i32, %arg1: memref<6x8xi32, #tpu.memory_space<smem>>, %arg2: memref<6xi32, #tpu.memory_space<smem>>) -> (i32, i32) {
    %c0_i32 = arith.constant 0 : i32
    %c0_i32_0 = arith.constant 0 : i32
    %c0_i32_1 = arith.constant 0 : i32
    return %c0_i32, %c0_i32_0 : i32, i32
  }
  func.func @transform_5(%arg0: i32, %arg1: memref<6x8xi32, #tpu.memory_space<smem>>, %arg2: memref<6xi32, #tpu.memory_space<smem>>) -> (i32, i32) {
    %c0_i32 = arith.constant 0 : i32
    %c0_i32_0 = arith.constant 0 : i32
    %c0_i32_1 = arith.constant 0 : i32
    return %c0_i32, %c0_i32_0 : i32, i32
  }
  func.func @transform_6(%arg0: i32, %arg1: memref<6x8xi32, #tpu.memory_space<smem>>, %arg2: memref<6xi32, #tpu.memory_space<smem>>) -> (i32, i32, i32) {
    %c0_i32 = arith.constant 0 : i32
    %c0_i32_0 = arith.constant 0 : i32
    %c0_i32_1 = arith.constant 0 : i32
    return %arg0, %c0_i32, %c0_i32_0 : i32, i32, i32
  }
  func.func @transform_7(%arg0: i32, %arg1: memref<6x8xi32, #tpu.memory_space<smem>>, %arg2: memref<6xi32, #tpu.memory_space<smem>>) -> (i32, i32) {
    %c0_i32 = arith.constant 0 : i32
    %c0_i32_0 = arith.constant 0 : i32
    %c0_i32_1 = arith.constant 0 : i32
    return %c0_i32, %c0_i32_0 : i32, i32
  }
}

</mosaic_0001>

<bundles_post_ra>
// kernel: seq2seq_decode.1
= control target key start
LH: loop header
LB: loop body
LE: loop exit
PB: predicated region body
PF: predicated region fallthrough
CT: control target
= control target key end

     0   :  { %s2879_s0 = inlined_call_operand.vmem [shape: s32[6,8], index: 0, kind: input, shape index: {}]   ;;  %s2880_s2 = inlined_call_operand.vmem [shape: f32[8,128], index: 2, kind: input, shape index: {}]   ;;  %s2881_s3 = inlined_call_operand.vmem [shape: bf16[8,8,64], index: 3, kind: input, shape index: {}]   ;;  %s2882_s4 = inlined_call_operand.vmem [shape: f32[8,8,128], index: 4, kind: input, shape index: {}]   ;;  %s2883_s5 = inlined_call_operand.vmem [shape: bf16[128,128], index: 5, kind: input, shape index: {}]   ;;  %s2884_s6 = inlined_call_operand.hbm [shape: bf16[320,512], index: 6, kind: input, shape index: {}]   ;;  %s2885_s7 = inlined_call_operand.vmem [shape: f32[8,384], index: 7, kind: input, shape index: {}]   ;;  %s2886_s8 = inlined_call_operand.vmem [shape: f32[6,8,128], index: 8, kind: output, shape index: {0}]   ;;  %s2887_s9 = inlined_call_operand.vmem [shape: f32[8,128], index: 9, kind: output, shape index: {1}]   ;;  %s2888_s1 = inlined_call_operand.vmem [shape: s32[6], index: 1, kind: input, shape index: {}]  }
   0x1   :  { %s15_s11 = sshll.u32 %s2879_s0, 4  ;;  %s19_s14 = sshll.u32 %s2888_s1, 4  ;;  %s16_s11 = int_to_ptr.vmem [resolvable:$true] %s15_s11  ;;  %s20_s14 = int_to_ptr.vmem [resolvable:$true] %s19_s14 }
   0x2   :  { %s2394_s15 = scalar_lea.vmem %s16_s11, 128  ;;  %p2399_p1 = scmp.lt.s32.totalorder %s16_s11, %s16_s11 }
   0x3   :  { %p2395_p0 = scmp.ne.s32.totalorder %s16_s11, %s2394_s15  ;;  %p2400_p2 = scmp.lt.s32.totalorder %s2394_s15, %s2394_s15 }
   0x5   :  { %p2401_p3 = por %p2400_p2, %p2399_p1 }
   0x7   :  { %p2402_p4 = pnand %p2401_p3, %p2395_p0 }
   0x9   :  { %2405 = shalt.err (!%p2402_p4)  }
   0xa   :  { %s2460_s16 = smov [#allocation4]   ;;  %s2406_s17 = scalar_lea.vmem %s20_s14, 16 }
   0xb   :  { %18 = dma.vmem_to_smem %s16_s11, 128, %s2460_s16, [#allocation3] }
   0xc   :  { %p2407_p5 = scmp.ne.s32.totalorder %s20_s14, %s2406_s17  ;;  %p2411_p6 = scmp.lt.s32.totalorder %s20_s14, %s20_s14 }
   0xd   :  { %p2412_p7 = scmp.lt.s32.totalorder %s2406_s17, %s2406_s17 }
   0xf   :  { %p2413_p8 = por %p2412_p7, %p2411_p6 }
  0x11   :  { %p2414_p9 = pnand %p2413_p8, %p2407_p5 }
  0x13   :  { %2417 = shalt.err (!%p2414_p9)  }
  0x14   :  { %s2461_s0 = smov [#allocation5]  }
  0x15   :  { %22 = dma.vmem_to_smem %s20_s14, 16, %s2461_s0, [#allocation3] }
  0x16   :  { %2450 = dma.done.wait [#allocation3], 144 }
  0x17   :  { %2451 = vsyncadd [#allocation3], 4294967152 }
  0x18   :  { %24 = sfence }
  0x19   :  { %25 = vsyncpa [#allocation7], 0  ;;  %s2526_s1 = smov 0  }
  0x1a LB: > { %s2532_s18 = sadd.s32 4294967295, %s2458_s1   ;;  %p1976_p10 = scmp.ge.s32.totalorder %s2458_s1, 1  ;;  %s2458_s1 = sphi %s2526_s1, %s31_s1  }
  0x1b   : > { %p209_p11 = scmp.lt.s32.totalorder %s2458_s1, 7  ;;  %s2462_s19 = smov [#allocation6]  }
  0x1c   : > { %s233_s20 = sshll.u32 %s2462_s19, 4  ;;  %p2889_p0 = scmp.eq.s32.totalorder %s2532_s18, 0  ;;  %s234_s20 = int_to_ptr.vmem [resolvable:$true] %s233_s20 }
  0x1d   : > { %p2537_p13 = pnand %p1976_p10, %p209_p11  ;;  %s2418_s25 = scalar_lea.hbm %s2884_s6, 10240 }
  0x1e   : > { %p2419_p3 = scmp.ne.s32.totalorder %s2884_s6, %s2418_s25  ;;  %p2425_p7 = scmp.lt.u32.totalorder %s2418_s25, %s2884_s6 }
  0x1f   : > { %s2891_s21 = scalar_select %p2537_p13, 1, 0 }
  0x20   : > { %p2203_p1 = pneg %p2537_p13 }
  0x22   : > { %p2546_p2 = pnand %p2889_p0, %p2203_p1 }
  0x24   : > { %p2420_p4 = pneg %p2546_p2 }
  0x26   : > { %p2421_p5 = pnand %p2420_p4, %p2419_p3 }
  0x28   : > { %p2422_p6 = pneg %p2421_p5 }
  0x2a   : > { %p2427_p8 = pnand %p2425_p7, %p2422_p6 }
  0x2c   : > { %2430 = shalt.err (!%p2427_p8)
}
  0x2d   : > { %s2431_s30 = scalar_lea.vmem %s234_s20, 10240  ;;  %p2439_p1 = scmp.lt.s32.totalorder %s234_s20, %s234_s20 }
  0x2e   : > { %p2432_p9 = scmp.ne.s32.totalorder %s234_s20, %s2431_s30  ;;  %p2440_p12 = scmp.lt.s32.totalorder %s2431_s30, %s2431_s30 }
  0x30   : > { %p2434_p10 = pnand %p2432_p9, %p2420_p4  ;;  %p2441_p0 = por %p2440_p12, %p2439_p1 }
  0x32   : > { %p2435_p11 = pneg %p2434_p10 }
  0x34   : > { %p2442_p13 = pnand %p2441_p0, %p2435_p11 }
  0x36   : > { %2445 = shalt.err (!%p2442_p13)
}
  0x37   : > { %s2463_s10 = smov 256   ;;  %s2464_s11 = smov 16  }
  0x38   : > { %2206 = dma.hbm_to_vmem [thread:$0]  (!%p2546_p2), %s2884_s6, 10240, %s234_s20, [#allocation7], %s2463_s10, %s2463_s10, %s2464_s11  }
  0x39   : > { %p2893_p3 = scmp.ne.s32.totalorder %s2891_s21, 0 }
  0x3a   : > { %p2894_p5 = scmp.eq.s32.totalorder (!%p2893_p3), %s2532_s18, 0 }
  0x3b   : > { %252 = sbr.rel (%p2893_p3) target bundleno = 2126 (0x84e), region = 44 }
  0x42   : > { %2453 = dma.done.wait (%p2894_p5), [#allocation7], 10240   ;;  %p2895_p4 = pmov %p2894_p5 }
  0x43   : > { %p278_p12 = scmp.lt.s32.totalorder %s2532_s18, 5  ;;  %v283_v0 = vlaneseq  ;;  %p2896_p13 = scmp.ne.s32.totalorder %s2532_s18, 0 }
  0x44   : > { %2455 = vsyncadd (%p2895_p4), [#allocation7], 4294957056  ;;  %v291_v3 = vld [vmem:[%s2880_s2] sm:$0xff] (!%p2896_p13)  ;;  %v2465_v4 = vmov (!%p2896_p13), 0.0  }
  0x45   : > { %s279_s14 = scalar_select %p278_p12, %s2532_s18, 5  ;;  %v2574_v1 = vand.u32 127, %v283_v0  ;;  %v2576_v2 = vshrl.u32 %v283_v0, 7 }
  0x46   : > { %290 = sbr.rel (%p2896_p13) target bundleno = 77 (0x4d), region = 52  ;;  %292 = vst [vmem:[%s2887_s9] sm:$0xff] (!%p2896_p13), %v291_v3 }
  0x47   : > { %s1980_s15 = sshll.u32 %s279_s14, 3  ;;  %vm293_vm0 = vcmp.eq.s32.totalorder (!%p2896_p13), %v2574_v1, 1 }
  0x48   : > { %s2581_s0 = scalar_lea.vmem %s2886_s8, %s1980_s15  ;;  %v1982_v5 = vsel (!%p2896_p13), %vm293_vm0, 1.0, %v2465_v4 }
  0x49   : > { %296 = vst [vmem:[#allocation2] sm:$0xff] (!%p2896_p13), %v1982_v5 }
  0x4d PF: > { %v2229_v6 = vld [vmem:[%s2883_s5] sm:$0xff]   ;;  %v2466_v7 = vmov 0.0   ;;  %v2230_v8 = vld [vmem:[%s2883_s5 + $0x8] sm:$0xff]   ;;  %vm2467_vm1 = vmmov 0   ;;  %v2231_v9 = vld [vmem:[%s2883_s5 + $0x10] sm:$0xff]   ;;  %v2634_v25 = vsub.s32 0, %v2576_v2 }
  0x4e   : > { %2127 = vmatprep.subr.bf16.mxu0 %v2466_v7  ;;  %2143 = vmatprep.mubr.msk.bf16.mxu0 %vm2467_vm1, %v2466_v7  ;;  %v2232_v10 = vld [vmem:[%s2883_s5 + $0x18] sm:$0xff]   ;;  %v2233_v11 = vld [vmem:[%s2883_s5 + $0x20] sm:$0xff]   ;;  %v2234_v12 = vld [vmem:[%s2883_s5 + $0x28] sm:$0xff]   ;;  %v2468_v17 = vmov 1966171168   ;;  %vm584_vm2 = vcmask 1041409  }
  0x4f   : > { %2128 = vmatpush3.bf16.msra.mxu0 %v2229_v6  ;;  %v2235_v13 = vld [vmem:[%s2883_s5 + $0x30] sm:$0xff]   ;;  %v2236_v14 = vld [vmem:[%s2883_s5 + $0x38] sm:$0xff]   ;;  %v297_v15 = vld [vmem:[%s2887_s9] sm:$0xff]  ;;  %v416_v18 = vunpack.c.l.s4 %v2468_v17  ;;  %vm586_vm3 = vcmask 1042434   ;;  %vm588_vm4 = vcmask 1043459   ;;  %vm590_vm5 = vcmask 1044484  }
  0x50   : > { %2129 = vmatprep.subr.bf16.mxu0 %v2466_v7  ;;  %v2629_v16 = vpack.c.bf16 %v297_v15, %v297_v15  ;;  %v405_v31 = vld [vmem:[%s2882_s4] sm:$0xff]  ;;  %v406_v37 = vld [vmem:[%s2882_s4 + $0x8] sm:$0xff]  ;;  %v407_v38 = vld [vmem:[%s2882_s4 + $0x10] sm:$0xff]  ;;  %vm592_vm6 = vcmask 1045509   ;;  %vm594_vm7 = vcmask 1046534   ;;  %vm596_vm8 = vcmask 1047559  }
  0x51   : > { %v417_v19 = vunpack.c.0.s8 %v416_v18  ;;  %v408_v42 = vld [vmem:[%s2882_s4 + $0x18] sm:$0xff]  ;;  %v409_v47 = vld [vmem:[%s2882_s4 + $0x20] sm:$0xff]  ;;  %v410_v54 = vld [vmem:[%s2882_s4 + $0x28] sm:$0xff]  ;;  %vm599_vm9 = vcmask 64512   ;;  %vm857_vm10 = vcmask 523264   ;;  %vm1816_vm11 = vcmp.lt.s32.totalorder %v2574_v1, 16 }
  0x52   : > { %v411_v57 = vld [vmem:[%s2882_s4 + $0x30] sm:$0xff]  ;;  %v412_v61 = vld [vmem:[%s2882_s4 + $0x38] sm:$0xff]  ;;  %v519_v62 = vld [vmem:[%s2885_s7] ss:$0 sm:$0xff]  ;;  %s2838_s16 = sshll.u32 %s2532_s18, 7  ;;  %vm1840_vm15 = vcmp.eq.s32.totalorder %v2576_v2, 0 }
  0x53   : > { %2130 = vmatpush3.bf16.msra.mxu0 %v2230_v8  ;;  %v420_v20 = vsub.s32 %v417_v19, %v2576_v2  ;;  %s1842_s17 = sld [smem:[#allocation4 + %s2838_s16]]  ;;  %s1857_s20 = sadd.s32 2, %s2838_s16 }
  0x54   : > { %2131 = vmatprep.subr.bf16.mxu0 %v2466_v7  ;;  %s1858_s21 = sld [smem:[#allocation4 + %s1857_s20]]  ;;  %s1865_s22 = sadd.s32 3, %s2838_s16 }
  0x55   : > { %s1866_s23 = sld [smem:[#allocation4 + %s1865_s22]]  ;;  %s1873_s24 = sadd.s32 4, %s2838_s16 }
  0x56   : > { %s1874_s25 = sld [smem:[#allocation4 + %s1873_s24]]  ;;  %s1881_s26 = sadd.s32 5, %s2838_s16 }
  0x57   : > { %2132 = vmatpush3.bf16.msra.mxu0 %v2231_v9  ;;  %s1882_s27 = sld [smem:[#allocation4 + %s1881_s26]]  ;;  %s1889_s28 = sadd.s32 6, %s2838_s16 }
  0x58   : > { %2133 = vmatprep.subr.bf16.mxu0 %v2466_v7  ;;  %s1890_s29 = sld [smem:[#allocation4 + %s1889_s28]]  ;;  %s1897_s30 = sadd.s32 7, %s2838_s16 }
  0x59   : > { %s1904_s10 = sld [smem:[#allocation5 + %s2532_s18]] }
  0x5a   : > { %s1898_s11 = sld [smem:[#allocation4 + %s1897_s30]] }
  0x5b   : > { %2134 = vmatpush3.bf16.msra.mxu0 %v2232_v10 }
  0x5c   : > { %2135 = vmatprep.subr.bf16.mxu0 %v2466_v7 }
  0x5f   : > { %2136 = vmatpush3.bf16.msra.mxu0 %v2233_v11  ;;  %p1905_p0 = scmp.ne.s32.totalorder %s1904_s10, 0 }
  0x60   : > { %2137 = vmatprep.subr.bf16.mxu0 %v2466_v7 }
  0x61   : > { %s1906_s18 = scalar_select %p1905_p0, 1, 0 }
  0x63   : > { %2138 = vmatpush3.bf16.msra.mxu0 %v2234_v12  ;;  %s1907_s12 = scvt.s32.f32 %s1906_s18 }
  0x64   : > { %2139 = vmatprep.subr.bf16.mxu0 %v2466_v7 }
  0x65   : > { %s1910_s13 = ssub.f32 1.0, %s1907_s12 }
  0x67   : > { %2140 = vmatpush3.bf16.msra.mxu0 %v2235_v13 }
  0x68   : > { %2141 = vmatprep.subr.bf16.mxu0 %v2466_v7 }
  0x6b   : > { %2142 = vmatpush3.bf16.msra.mxu0 %v2236_v14 }
  0x6e   : > { %2144 = vmatmul.mubr.bf16.vlgmr.msra.gmra.mrb[0].mxu0 %v2629_v16 }
 0x141   : > { %v399_v21 = vpop.f32.mrb[0].mxu0 }
 0x142   : > { %v414_v22 = vcombine.high %v399_v21, %v399_v21  ;;  %v421_v23 = vrot.slane %v399_v21, %v420_v20  ;;  %v2145_v24 = vpop.f32.mrb[1].mxu0  ;;  %v2673_v21 = vsub.s32 %v2574_v1, %v2576_v2 }
 0x143   : > { %v402_v26 = vpop.f32.mrb[2].mxu0 }
 0x144   : > { %v428_v27 = vrot.slane %v414_v22, %v420_v20  ;;  %v429_v28 = vcombine.high %v421_v23, %v421_v23  ;;  %v437_v29 = vrot.slane %v421_v23, %v420_v20  ;;  %v2146_v30 = vpop.f32.mrb[3].mxu0 }
 0x146   : > { %v430_v32 = vcombine.high %v428_v27, %v428_v27  ;;  %v444_v33 = vrot.slane %v428_v27, %v420_v20  ;;  %v451_v34 = vrot.slane %v429_v28, %v420_v20  ;;  %v459_v35 = vcombine.high %v437_v29, %v437_v29 }
 0x147   : > { %v466_v36 = vrot.slane %v437_v29, %v2634_v25 }
 0x148   : > { %v458_v39 = vrot.slane %v430_v32, %v420_v20  ;;  %v461_v40 = vcombine.high %v451_v34, %v451_v34  ;;  %v470_v41 = vrot.slane %v451_v34, %v2634_v25  ;;  %v460_v43 = vcombine.high %v444_v33, %v444_v33 }
 0x149   : > { %v474_v44 = vrot.slane %v459_v35, %v2634_v25  ;;  %v482_v45 = vrot.slane %v444_v33, %v2634_v25  ;;  %v503_v46 = vadd.f32 %v466_v36, %v405_v31 }
 0x14a   : > { %v478_v48 = vrot.slane %v461_v40, %v2634_v25  ;;  %v504_v49 = vadd.f32 %v470_v41, %v406_v37  ;;  %v462_v51 = vcombine.high %v458_v39, %v458_v39  ;;  %v486_v52 = vrot.slane %v458_v39, %v2634_v25 }
 0x14b   : > { %v505_v50 = vadd.f32 %v474_v44, %v407_v38  ;;  %2349 = vtanh.f32 %v503_v46  ;;  %v490_v55 = vrot.slane %v460_v43, %v2634_v25  ;;  %v507_v56 = vadd.f32 %v482_v45, %v409_v47 }
 0x14c   : > { %v506_v53 = vadd.f32 %v478_v48, %v408_v42  ;;  %2351 = vtanh.f32 %v504_v49  ;;  %v494_v58 = vrot.slane %v462_v51, %v2634_v25  ;;  %v508_v59 = vadd.f32 %v486_v52, %v410_v54 }
 0x14d   : > { %2353 = vtanh.f32 %v505_v50  ;;  %v509_v60 = vadd.f32 %v490_v55, %v411_v57  ;;  %v2469_v46 = vmov 0   ;;  %v2696_v47 = vsub.s32 1, %v2576_v2 }
 0x14e   : > { %2355 = vtanh.f32 %v506_v53  ;;  %v510_v63 = vadd.f32 %v494_v58, %v412_v61  ;;  %2228 = vset.pattern.permute.xlu0 %v2469_v46  ;;  %2227 = vset.pattern.permute.xlu1 %v2469_v46  ;;  %v2699_v48 = vsub.s32 2, %v2576_v2  ;;  %v618_v49 = vsub.s32 3, %v2576_v2 }
 0x14f   : > { %2357 = vtanh.f32 %v507_v56  ;;  %1146 = vmatprep.mubr.bf16.mxu1 %v2469_v46  ;;  %1187 = vmatprep.mubr.bf16.mxu0 %v2469_v46  ;;  %v622_v54 = vsub.s32 4, %v2576_v2  ;;  %v626_v61 = vsub.s32 5, %v2576_v2 }
 0x150   : > { %2359 = vtanh.f32 %v508_v59 }
 0x151   : > { %2361 = vtanh.f32 %v509_v60 }
 0x152   : > { %2363 = vtanh.f32 %v510_v63 }
 0x155   : > { %v2350_v0 = vpop.eup %2349 }
 0x156   : > { %v520_v3 = vmul.f32 %v2350_v0, %v519_v62  ;;  %v2352_v4 = vpop.eup %2351 }
 0x157   : > { %v2354_v5 = vpop.eup %2353  ;;  %v521_v9 = vmul.f32 %v2352_v4, %v519_v62 }
 0x158   : > { %528 = vadd.xlane.f32.xlu0 %v520_v3  ;;  %v522_v6 = vmul.f32 %v2354_v5, %v519_v62  ;;  %v2356_v8 = vpop.eup %2355  ;;  %v630_v3 = vsub.s32 6, %v2576_v2 }
 0x159   : > { %v2358_v10 = vpop.eup %2357  ;;  %v523_v11 = vmul.f32 %v2356_v8, %v519_v62  ;;  %v634_v8 = vsub.s32 7, %v2576_v2 }
 0x15a   : > { %532 = vadd.xlane.f32.xlu1 %v522_v6  ;;  %v2360_v12 = vpop.eup %2359  ;;  %v524_v13 = vmul.f32 %v2358_v10, %v519_v62 }
 0x15b   : > { %v2362_v14 = vpop.eup %2361  ;;  %v525_v15 = vmul.f32 %v2360_v12, %v519_v62 }
 0x15c   : > { %530 = vadd.xlane.f32.xlu0 %v521_v9  ;;  %v2364_v17 = vpop.eup %2363  ;;  %v526_v18 = vmul.f32 %v2362_v14, %v519_v62 }
 0x15d   : > { %v527_v19 = vmul.f32 %v2364_v17, %v519_v62 }
 0x15e   : > { %534 = vadd.xlane.f32.xlu1 %v523_v11 }
 0x160   : > { %536 = vadd.xlane.f32.xlu0 %v524_v13 }
 0x162   : > { %538 = vadd.xlane.f32.xlu1 %v525_v15 }
 0x164   : > { %540 = vadd.xlane.f32.xlu0 %v526_v18 }
 0x166   : > { %542 = vadd.xlane.f32.xlu1 %v527_v19 }
 0x1e5   : > { %v529_v20 = vpop.xlane.xlu0 %528 }
 0x1e6   : > { %v555_v24 = vrot.slane %v529_v20, %v2673_v21 }
 0x1e7   : > { %v533_v22 = vpop.xlane.xlu1 %532 }
 0x1e8   : > { %v563_v27 = vrot.slane %v533_v22, %v2673_v21 }
 0x1e9   : > { %v531_v23 = vpop.xlane.xlu0 %530 }
 0x1ea   : > { %v559_v26 = vrot.slane %v531_v23, %v2673_v21 }
 0x1eb   : > { %v535_v29 = vpop.xlane.xlu1 %534 }
 0x1ec   : > { %v585_v28 = vsel %vm584_vm2, %v559_v26, %v555_v24  ;;  %v567_v31 = vrot.slane %v535_v29, %v2673_v21 }
 0x1ed   : > { %v587_v30 = vsel %vm586_vm3, %v563_v27, %v585_v28  ;;  %v537_v32 = vpop.xlane.xlu0 %536 }
 0x1ee   : > { %v571_v33 = vrot.slane %v537_v32, %v2673_v21  ;;  %v589_v34 = vsel %vm588_vm4, %v567_v31, %v587_v30 }
 0x1ef   : > { %v539_v36 = vpop.xlane.xlu1 %538 }
 0x1f0   : > { %v591_v35 = vsel %vm590_vm5, %v571_v33, %v589_v34  ;;  %v575_v37 = vrot.slane %v539_v36, %v2673_v21 }
 0x1f1   : > { %v541_v38 = vpop.xlane.xlu0 %540 }
 0x1f2   : > { %v579_v39 = vrot.slane %v541_v38, %v2673_v21  ;;  %v593_v40 = vsel %vm592_vm6, %v575_v37, %v591_v35 }
 0x1f3   : > { %v543_v41 = vpop.xlane.xlu1 %542 }
 0x1f4   : > { %v595_v42 = vsel %vm594_vm7, %v579_v39, %v593_v40  ;;  %v583_v43 = vrot.slane %v543_v41, %v2673_v21 }
 0x1f6   : > { %v597_v44 = vsel %vm596_vm8, %v583_v43, %v595_v42 }
 0x1f7   : > { %v600_v45 = vsel %vm599_vm9, %v597_v44, -inf }
 0x1f8   : > { %601 = vmax.xlane.f32.xlu0 %v600_v45 }
 0x285   : > { %v602_v50 = vpop.xlane.xlu0 %601 }
 0x286   : > { %v607_v51 = vrot.slane %v602_v50, %v2634_v25  ;;  %v611_v52 = vrot.slane %v602_v50, %v2696_v47  ;;  %v615_v53 = vrot.slane %v602_v50, %v2699_v48  ;;  %v619_v55 = vrot.slane %v602_v50, %v618_v49 }
 0x287   : > { %v623_v62 = vrot.slane %v602_v50, %v622_v54  ;;  %v627_v4 = vrot.slane %v602_v50, %v626_v61  ;;  %v631_v9 = vrot.slane %v602_v50, %v630_v3  ;;  %v635_v14 = vrot.slane %v602_v50, %v634_v8 }
 0x288   : > { %v644_v56 = vsub.f32 %v529_v20, %v607_v51  ;;  %v645_v57 = vsub.f32 %v531_v23, %v611_v52  ;;  %v646_v58 = vsub.f32 %v533_v22, %v615_v53  ;;  %v647_v63 = vsub.f32 %v535_v29, %v619_v55 }
 0x289   : > { %v648_v5 = vsub.f32 %v537_v32, %v623_v62  ;;  %v649_v10 = vsub.f32 %v539_v36, %v627_v4  ;;  %v650_v15 = vsub.f32 %v541_v38, %v631_v9  ;;  %v651_v19 = vsub.f32 %v543_v41, %v635_v14  ;;  %v2239_v9 = vld [vmem:[#allocation6] ss:$16 sps:$4 sm:$0xff]  }
 0x28a   : > { %v652_v59 = vmul.f32 1.442695, %v644_v56  ;;  %v654_v60 = vmul.f32 1.442695, %v645_v57  ;;  %v656_v0 = vmul.f32 1.442695, %v646_v58 }
 0x28b   : > { %v658_v6 = vmul.f32 1.442695, %v647_v63  ;;  %v660_v11 = vmul.f32 1.442695, %v648_v5  ;;  %v662_v17 = vmul.f32 1.442695, %v649_v10 }
 0x28c   : > { %2365 = vpow2.f32 %v652_v59  ;;  %v664_v20 = vmul.f32 1.442695, %v650_v15  ;;  %v666_v23 = vmul.f32 1.442695, %v651_v19  ;;  %v2242_v14 = vld [vmem:[#allocation6 + $0x20] ss:$16 sps:$4 sm:$0xff]  }
 0x28d   : > { %2367 = vpow2.f32 %v654_v60 }
 0x28e   : > { %2369 = vpow2.f32 %v656_v0 }
 0x28f   : > { %2371 = vpow2.f32 %v658_v6  ;;  %v2237_v6 = vld [vmem:[#allocation6 + $0x4] ss:$16 sps:$4 sm:$0xff]  }
 0x290   : > { %2373 = vpow2.f32 %v660_v11  ;;  %1114 = vmatprep.subr.bf16.mxu1 %v2237_v6  ;;  %v2337_v6 = vld [vmem:[#allocation6 + $0x208] ss:$16 sps:$4 sm:$0xff]  }
 0x291   : > { %2375 = vpow2.f32 %v662_v17  ;;  %1115 = vmatpush1.bf16.msra.mxu1 %v2239_v9  ;;  %v2243_v17 = vld [vmem:[#allocation6 + $0x44] ss:$16 sps:$4 sm:$0xff]   ;;  %v2338_v9 = vld [vmem:[#allocation6 + $0x228] ss:$16 sps:$4 sm:$0xff]  }
 0x292   : > { %2377 = vpow2.f32 %v664_v20  ;;  %v2246_v20 = vld [vmem:[#allocation6 + $0x64] ss:$16 sps:$4 sm:$0xff]  }
 0x293   : > { %2379 = vpow2.f32 %v666_v23 }
 0x296   : > { %v2366_v12 = vpop.eup %2365 }
 0x297   : > { %v2368_v13 = vpop.eup %2367  ;;  %677 = vperm.xlu1 %2227, %v2366_v12  }
 0x298   : > { %680 = vperm.xlu0 %2228, %v2368_v13   ;;  %v2370_v18 = vpop.eup %2369 }
 0x299   : > { %v2372_v22 = vpop.eup %2371 }
 0x29a   : > { %v2374_v24 = vpop.eup %2373 }
 0x29b   : > { %683 = vperm.xlu1 %2227, %v2370_v18   ;;  %v2376_v26 = vpop.eup %2375 }
 0x29c   : > { %v2719_v27 = vpop.eup %2377 }
 0x29d   : > { %v2722_v28 = vpop.eup %2379 }
 0x29f   : > { %686 = vperm.xlu1 %2227, %v2372_v22  }
 0x2a3   : > { %689 = vperm.xlu1 %2227, %v2374_v24  }
 0x2a7   : > { %692 = vperm.xlu1 %2227, %v2376_v26  }
 0x2ab   : > { %695 = vperm.xlu1 %2227, %v2719_v27  }
 0x2af   : > { %698 = vperm.xlu1 %2227, %v2722_v28  }
 0x316   : > { %v678_v29 = vpop.permute.xlu1 %677 }
 0x317   : > { %v681_v33 = vpop.permute.xlu0 %680  ;;  %v703_v36 = vrot.slane %v678_v29, %v2673_v21  ;;  %v2252_v29 = vld [vmem:[#allocation6 + $0xa4] ss:$16 sps:$4 sm:$0xff]  }
 0x318   : > { %v707_v35 = vrot.slane %v681_v33, %v2673_v21  ;;  %v2266_v33 = vld [vmem:[#allocation6 + $0x104] ss:$16 sps:$4 sm:$0xff]  }
 0x31a   : > { %v684_v30 = vpop.permute.xlu1 %683  ;;  %v732_v41 = vsel %vm584_vm2, %v707_v35, %v703_v36  ;;  %v2261_v35 = vld [vmem:[#allocation6 + $0x8] ss:$16 sps:$4 sm:$0xff]   ;;  %v2264_v36 = vld [vmem:[#allocation6 + $0x100] ss:$16 sps:$4 sm:$0xff]  }
 0x31b   : > { %v711_v37 = vrot.slane %v684_v30, %v2673_v21  ;;  %v2254_v30 = vld [vmem:[#allocation6 + $0xa0] ss:$16 sps:$4 sm:$0xff]  }
 0x31d   : > { %v733_v43 = vsel %vm586_vm3, %v711_v37, %v732_v41  ;;  %v2273_v41 = vld [vmem:[#allocation6 + $0x48] ss:$16 sps:$4 sm:$0xff]  }
 0x31e   : > { %v687_v31 = vpop.permute.xlu1 %686 }
 0x31f   : > { %v715_v38 = vrot.slane %v687_v31, %v2673_v21  ;;  %v2257_v31 = vld [vmem:[#allocation6 + $0xc0] ss:$16 sps:$4 sm:$0xff]  }
 0x321   : > { %v734_v45 = vsel %vm588_vm4, %v715_v38, %v733_v43  ;;  %v2272_v38 = vld [vmem:[#allocation6 + $0x124] ss:$16 sps:$4 sm:$0xff]   ;;  %v2276_v43 = vld [vmem:[#allocation6 + $0x140] ss:$16 sps:$4 sm:$0xff]  }
 0x322   : > { %v690_v32 = vpop.permute.xlu1 %689 }
 0x323   : > { %v719_v39 = vrot.slane %v690_v32, %v2673_v21  ;;  %v2260_v32 = vld [vmem:[#allocation6 + $0xe0] ss:$16 sps:$4 sm:$0xff]  }
 0x325   : > { %v735_v50 = vsel %vm590_vm5, %v719_v39, %v734_v45  ;;  %v2267_v39 = vld [vmem:[#allocation6 + $0x28] ss:$16 sps:$4 sm:$0xff]   ;;  %v2281_v45 = vld [vmem:[#allocation6 + $0x6c] ss:$16 sps:$4 sm:$0xff]  }
 0x326   : > { %v693_v34 = vpop.permute.xlu1 %692 }
 0x327   : > { %v723_v42 = vrot.slane %v693_v34, %v2673_v21  ;;  %v299_v34 = vld [vmem:[#allocation2] sm:$0xff] }
 0x328   : > { %v300_v37 = vpack.c.bf16 %v299_v34, %v299_v34 }
 0x329   : > { %v736_v52 = vsel %vm592_vm6, %v723_v42, %v735_v50  ;;  %v2275_v42 = vld [vmem:[#allocation6 + $0x4c] ss:$16 sps:$4 sm:$0xff]   ;;  %v2284_v50 = vld [vmem:[#allocation6 + $0x164] ss:$16 sps:$4 sm:$0xff]  }
 0x32a   : > { %v696_v40 = vpop.permute.xlu1 %695 }
 0x32b   : > { %v727_v44 = vrot.slane %v696_v40, %v2673_v21  ;;  %v2270_v40 = vld [vmem:[#allocation6 + $0x120] ss:$16 sps:$4 sm:$0xff]  }
 0x32d   : > { %v737_v55 = vsel %vm594_vm7, %v727_v44, %v736_v52  ;;  %v2278_v44 = vld [vmem:[#allocation6 + $0x144] ss:$16 sps:$4 sm:$0xff]   ;;  %v2282_v52 = vld [vmem:[#allocation6 + $0x160] ss:$16 sps:$4 sm:$0xff]  }
 0x32e   : > { %v699_v51 = vpop.permute.xlu1 %698 }
 0x32f   : > { %v731_v53 = vrot.slane %v699_v51, %v2673_v21  ;;  %v2279_v51 = vld [vmem:[#allocation6 + $0x68] ss:$16 sps:$4 sm:$0xff]  }
 0x331   : > { %v738_v56 = vsel %vm596_vm8, %v731_v53, %v737_v55  ;;  %v2287_v53 = vld [vmem:[#allocation6 + $0x8c] ss:$16 sps:$4 sm:$0xff]  }
 0x332   : > { %v740_v57 = vsel %vm599_vm9, %v738_v56, 0.0  ;;  %v2290_v55 = vld [vmem:[#allocation6 + $0x10c] ss:$16 sps:$4 sm:$0xff]   ;;  %v2285_v56 = vld [vmem:[#allocation6 + $0x88] ss:$16 sps:$4 sm:$0xff]  }
 0x333   : > { %741 = vadd.xlane.f32.xlu1 %v740_v57  ;;  %v2293_v57 = vld [vmem:[#allocation6 + $0xac] ss:$16 sps:$4 sm:$0xff]  }
 0x3c0   : > { %v742_v58 = vpop.xlane.xlu1 %741 }
 0x3c1   : > { %2381 = vrcp.f32 %v742_v58  ;;  %v2291_v58 = vld [vmem:[#allocation6 + $0xa8] ss:$16 sps:$4 sm:$0xff]  }
 0x3cb   : > { %v2382_v59 = vpop.eup %2381 }
 0x3cc   : > { %v748_v60 = vrot.slane %v2382_v59, %v2634_v25  ;;  %v752_v63 = vrot.slane %v2382_v59, %v2696_v47  ;;  %v756_v4 = vrot.slane %v2382_v59, %v2699_v48  ;;  %v760_v5 = vrot.slane %v2382_v59, %v618_v49  ;;  %v2245_v49 = vld [vmem:[#allocation6 + $0x40] ss:$16 sps:$4 sm:$0xff]  }
 0x3cd   : > { %v764_v11 = vrot.slane %v2382_v59, %v622_v54  ;;  %v768_v15 = vrot.slane %v2382_v59, %v626_v61  ;;  %v772_v19 = vrot.slane %v2382_v59, %v630_v3  ;;  %v2248_v54 = vld [vmem:[#allocation6 + $0x60] ss:$16 sps:$4 sm:$0xff]   ;;  %v776_v23 = vrot.slane %v2382_v59, %v634_v8  ;;  %v2249_v61 = vld [vmem:[#allocation6 + $0x84] ss:$16 sps:$4 sm:$0xff]   ;;  %v2263_v8 = vld [vmem:[#allocation6 + $0xc] ss:$16 sps:$4 sm:$0xff]  }
 0x3ce   : > { %v785_v62 = vmul.f32 %v2366_v12, %v748_v60  ;;  %v786_v0 = vmul.f32 %v2368_v13, %v752_v63  ;;  %v787_v21 = vmul.f32 %v2370_v18, %v756_v4  ;;  %v788_v10 = vmul.f32 %v2372_v22, %v760_v5  ;;  %v2240_v12 = vld [vmem:[#allocation6 + $0x24] ss:$16 sps:$4 sm:$0xff]   ;;  %1155 = vmatprep.subr.bf16.mxu0 %v2263_v8  ;;  %v2299_v59 = vld [vmem:[#allocation6 + $0xcc] ss:$16 sps:$4 sm:$0xff]   ;;  %v2297_v60 = vld [vmem:[#allocation6 + $0xc8] ss:$16 sps:$4 sm:$0xff]  }
 0x3cf   : > { %1116 = vmatprep.subr.bf16.mxu1 %v2240_v12  ;;  %v789_v13 = vmul.f32 %v2374_v24, %v764_v11  ;;  %v790_v18 = vmul.f32 %v2376_v26, %v768_v15  ;;  %v791_v22 = vmul.f32 %v2719_v27, %v772_v19  ;;  %v2251_v24 = vld [vmem:[#allocation6 + $0x80] ss:$16 sps:$4 sm:$0xff]   ;;  %v792_v26 = vmul.f32 %v2722_v28, %v776_v23  ;;  %v2255_v3 = vld [vmem:[#allocation6 + $0xc4] ss:$16 sps:$4 sm:$0xff]   ;;  %v2269_v28 = vld [vmem:[#allocation6 + $0x2c] ss:$16 sps:$4 sm:$0xff]  }
 0x3d0   : > { %811 = vperm.xlu0 %2228, %v785_v62   ;;  %1117 = vmatpush1.bf16.msra.mxu1 %v2242_v14  ;;  %v2258_v27 = vld [vmem:[#allocation6 + $0xe4] ss:$16 sps:$4 sm:$0xff]   ;;  %v2305_v62 = vld [vmem:[#allocation6 + $0xec] ss:$16 sps:$4 sm:$0xff]   ;;  %v2303_v63 = vld [vmem:[#allocation6 + $0xe8] ss:$16 sps:$4 sm:$0xff]  }
 0x3d1   : > { %1118 = vmatprep.subr.bf16.mxu1 %v2243_v17  ;;  %1156 = vmatpush1.bf16.msra.mxu0 %v2261_v35  ;;  %v2334_v4 = vld [vmem:[#allocation6 + $0x1a8] ss:$16 sps:$4 sm:$0xff]   ;;  %v2097_v17 = vld [vmem:[%s2881_s3 + $0x8] sm:$0xff]  }
 0x3d2   : > { %1157 = vmatprep.subr.bf16.mxu0 %v2269_v28  ;;  %v2336_v5 = vld [vmem:[#allocation6 + $0x1e8] ss:$16 sps:$4 sm:$0xff]  }
 0x3d3   : > { %v2340_v11 = vld [vmem:[#allocation6 + $0x268] ss:$16 sps:$4 sm:$0xff]  }
 0x3d4   : > { %816 = vperm.xlu0 %2228, %v786_v0   ;;  %1119 = vmatpush1.bf16.msra.mxu1 %v2245_v49  ;;  %v2330_v0 = vld [vmem:[#allocation6 + $0x188] ss:$16 sps:$4 sm:$0xff]  }
 0x3d5   : > { %1120 = vmatprep.subr.bf16.mxu1 %v2246_v20  ;;  %1158 = vmatpush1.bf16.msra.mxu0 %v2267_v39  ;;  %v2082_v12 = vld [vmem:[%s2881_s3] sm:$0xff]   ;;  %v2087_v20 = vunpack.c.l.bf16 %v2097_v17 }
 0x3d6   : > { %1159 = vmatprep.subr.bf16.mxu0 %v2275_v42  ;;  %v2084_v15 = vunpack.c.h.bf16 %v2082_v12  ;;  %v2099_v42 = vld [vmem:[%s2881_s3 + $0x18] sm:$0xff]  }
 0x3d8   : > { %821 = vperm.xlu0 %2228, %v787_v21   ;;  %1121 = vmatpush1.bf16.msra.mxu1 %v2248_v54  ;;  %v2335_v21 = vld [vmem:[#allocation6 + $0x1c8] ss:$16 sps:$4 sm:$0xff]  }
 0x3d9   : > { %1122 = vmatprep.subr.bf16.mxu1 %v2249_v61  ;;  %1160 = vmatpush1.bf16.msra.mxu0 %v2273_v41 }
 0x3da   : > { %1161 = vmatprep.subr.bf16.mxu0 %v2281_v45 }
 0x3dc   : > { %826 = vperm.xlu0 %2228, %v788_v10   ;;  %1123 = vmatpush1.bf16.msra.mxu1 %v2251_v24  ;;  %v2339_v10 = vld [vmem:[#allocation6 + $0x248] ss:$16 sps:$4 sm:$0xff]   ;;  %v2088_v24 = vunpack.c.h.bf16 %v2097_v17 }
 0x3dd   : > { %1124 = vmatprep.subr.bf16.mxu1 %v2252_v29  ;;  %1162 = vmatpush1.bf16.msra.mxu0 %v2279_v51  ;;  %v2098_v29 = vld [vmem:[%s2881_s3 + $0x10] sm:$0xff]  }
 0x3de   : > { %1163 = vmatprep.subr.bf16.mxu0 %v2287_v53  ;;  %v2091_v8 = vunpack.c.l.bf16 %v2098_v29  ;;  %v2092_v39 = vunpack.c.h.bf16 %v2098_v29 }
 0x3e0   : > { %831 = vperm.xlu0 %2228, %v789_v13   ;;  %1125 = vmatpush1.bf16.msra.mxu1 %v2254_v30  ;;  %v2083_v13 = vunpack.c.l.bf16 %v2082_v12 }
 0x3e1   : > { %1126 = vmatprep.subr.bf16.mxu1 %v2255_v3  ;;  %1164 = vmatpush1.bf16.msra.mxu0 %v2285_v56 }
 0x3e2   : > { %1165 = vmatprep.subr.bf16.mxu0 %v2293_v57 }
 0x3e4   : > { %836 = vperm.xlu0 %2228, %v790_v18   ;;  %1127 = vmatpush1.bf16.msra.mxu1 %v2257_v31 }
 0x3e5   : > { %1128 = vmatprep.subr.bf16.mxu1 %v2258_v27  ;;  %1166 = vmatpush1.bf16.msra.mxu0 %v2291_v58 }
 0x3e6   : > { %1167 = vmatprep.subr.bf16.mxu0 %v2299_v59 }
 0x3e8   : > { %841 = vperm.xlu0 %2228, %v791_v22   ;;  %1129 = vmatpush1.bf16.msra.mxu1 %v2260_v32 }
 0x3e9   : > { %1319 = vmatprep.subr.bf16.mxu1 %v2266_v33  ;;  %1168 = vmatpush1.bf16.msra.mxu0 %v2297_v60 }
 0x3ea   : > { %1169 = vmatprep.subr.bf16.mxu0 %v2305_v62 }
 0x3eb   : > { %1147 = vmatmul.mubr.bf16.vlgmr.msra.gmra.mrb[0].mxu1 %v300_v37 }
 0x3ec   : > { %846 = vperm.xlu0 %2228, %v792_v26   ;;  %1320 = vmatpush1.bf16.msra.mxu1 %v2264_v36 }
 0x3ed   : > { %1351 = vmatprep.mubr.bf16.mxu1 %v2469_v46  ;;  %1321 = vmatprep.subr.bf16.mxu1 %v2272_v38 }
 0x3ee   : > { %1170 = vmatpush1.bf16.msra.mxu0 %v2303_v63 }
 0x3ef   : > { %2147 = vmatprep.subr.bf16.mxu0 %v2466_v7 }
 0x3f0   : > { %1322 = vmatpush1.bf16.msra.mxu1 %v2270_v40 }
 0x3f1   : > { %1323 = vmatprep.subr.bf16.mxu1 %v2278_v44  ;;  %1188 = vmatmul.mubr.bf16.vlgmr.msra.gmra.mrb[4].mxu0 %v300_v37 }
 0x3f2   : > { %2163 = vmatprep.mubr.msk.bf16.mxu0 %vm2467_vm1, %v2466_v7  ;;  %2148 = vmatpush3.bf16.msra.mxu0 %v2330_v0 }
 0x3f3   : > { %2149 = vmatprep.subr.bf16.mxu0 %v2466_v7 }
 0x3f4   : > { %1324 = vmatpush1.bf16.msra.mxu1 %v2276_v43 }
 0x3f5   : > { %1325 = vmatprep.subr.bf16.mxu1 %v2284_v50 }
 0x3f6   : > { %2150 = vmatpush3.bf16.msra.mxu0 %v2334_v4 }
 0x3f7   : > { %2151 = vmatprep.subr.bf16.mxu0 %v2466_v7 }
 0x3f8   : > { %1326 = vmatpush1.bf16.msra.mxu1 %v2282_v52 }
 0x3f9   : > { %1360 = vmatprep.subr.bf16.mxu1 %v2290_v55  ;;  %v2095_v55 = vunpack.c.l.bf16 %v2099_v42 }
 0x3fa   : > { %2152 = vmatpush3.bf16.msra.mxu0 %v2335_v21 }
 0x3fb   : > { %2153 = vmatprep.subr.bf16.mxu0 %v2466_v7 }
 0x3fe   : > { %2154 = vmatpush3.bf16.msra.mxu0 %v2336_v5  ;;  %v2096_v5 = vunpack.c.h.bf16 %v2099_v42 }
 0x3ff   : > { %2155 = vmatprep.subr.bf16.mxu0 %v2466_v7 }
 0x402   : > { %2156 = vmatpush3.bf16.msra.mxu0 %v2337_v6 }
 0x403   : > { %2157 = vmatprep.subr.bf16.mxu0 %v2466_v7 }
 0x406   : > { %2158 = vmatpush3.bf16.msra.mxu0 %v2338_v9 }
 0x407   : > { %2159 = vmatprep.subr.bf16.mxu0 %v2466_v7 }
 0x40a   : > { %2160 = vmatpush3.bf16.msra.mxu0 %v2339_v10 }
 0x40b   : > { %2161 = vmatprep.subr.bf16.mxu0 %v2466_v7 }
 0x40e   : > { %2162 = vmatpush3.bf16.msra.mxu0 %v2340_v11 }
 0x40f   : > { %2167 = vmatprep.subr.bf16.mxu0 %v2466_v7 }
 0x411   : > { %2164 = vmatmul.mubr.bf16.vlgmr.msra.gmra.mrb[8].mxu0 %v2629_v16 }
 0x412   : > { %2183 = vmatprep.mubr.msk.bf16.mxu0 %vm2467_vm1, %v2466_v7  ;;  %vm1848_vm1 = vcmp.eq.s32.totalorder %v2576_v2, 1 }
 0x44f   : > { %v812_v14 = vpop.permute.xlu0 %811 }
 0x450   : > { %v849_v18 = vmul.f32 %v2083_v13, %v812_v14 }
 0x452   : > { %v858_v23 = vsel %vm857_vm10, %v849_v18, 0.0 }
 0x453   : > { %v817_v49 = vpop.permute.xlu0 %816  ;;  %v859_v3 = vrot.slane %v858_v23, 4 }
 0x454   : > { %v850_v19 = vmul.f32 %v2084_v15, %v817_v49 }
 0x455   : > { %v860_v36 = vadd.f32 %v859_v3, %v858_v23 }
 0x456   : > { %v865_v54 = vsel %vm857_vm10, %v850_v19, 0.0 }
 0x457   : > { %v822_v22 = vpop.permute.xlu0 %821  ;;  %v866_v26 = vrot.slane %v865_v54, 4  ;;  %v861_v45 = vrot.slane %v860_v36, 2 }
 0x458   : > { %v851_v61 = vmul.f32 %v2087_v20, %v822_v22 }
 0x459   : > { %v867_v33 = vadd.f32 %v866_v26, %v865_v54  ;;  %v862_v60 = vadd.f32 %v861_v45, %v860_v36 }
 0x45a   : > { %v872_v30 = vsel %vm857_vm10, %v851_v61, 0.0 }
 0x45b   : > { %v873_v31 = vrot.slane %v872_v30, 4  ;;  %v827_v27 = vpop.permute.xlu0 %826  ;;  %v868_v40 = vrot.slane %v867_v33, 2  ;;  %v863_v14 = vrot.slane %v862_v60, 1 }
 0x45c   : > { %v852_v32 = vmul.f32 %v2088_v24, %v827_v27 }
 0x45d   : > { %v874_v34 = vadd.f32 %v873_v31, %v872_v30  ;;  %v869_v56 = vadd.f32 %v868_v40, %v867_v33  ;;  %v864_v24 = vadd.f32 %v863_v14, %v862_v60  ;;  %v2308_v14 = vld [vmem:[#allocation6 + $0x16c] ss:$16 sps:$4 sm:$0xff]  }
 0x45e   : > { %v879_v35 = vsel %vm857_vm10, %v852_v32, 0.0 }
 0x45f   : > { %v880_v37 = vrot.slane %v879_v35, 4  ;;  %v832_v28 = vpop.permute.xlu0 %831  ;;  %v875_v43 = vrot.slane %v874_v34, 2  ;;  %v870_v6 = vrot.slane %v869_v56, 1 }
 0x460   : > { %v853_v38 = vmul.f32 %v2091_v8, %v832_v28 }
 0x461   : > { %v881_v41 = vadd.f32 %v880_v37, %v879_v35  ;;  %v876_v58 = vadd.f32 %v875_v43, %v874_v34  ;;  %v871_v20 = vadd.f32 %v870_v6, %v869_v56  ;;  %v914_v35 = vpack.c.bf16 %v864_v24, %v864_v24  ;;  %v2326_v24 = vld [vmem:[#allocation6 + $0x224] ss:$16 sps:$4 sm:$0xff]  }
 0x462   : > { %v886_v44 = vsel %vm857_vm10, %v853_v38, 0.0 }
 0x463   : > { %v882_v50 = vrot.slane %v881_v41, 2  ;;  %v887_v51 = vrot.slane %v886_v44, 4  ;;  %v837_v52 = vpop.permute.xlu0 %836  ;;  %v877_v10 = vrot.slane %v876_v58, 1  ;;  %v915_v27 = vpack.c.bf16 %v871_v20, %v871_v20  ;;  %v2315_v20 = vld [vmem:[#allocation6 + $0x1c0] ss:$16 sps:$4 sm:$0xff]  }
 0x464   : > { %v854_v53 = vmul.f32 %v2092_v39, %v837_v52 }
 0x465   : > { %v888_v57 = vadd.f32 %v887_v51, %v886_v44  ;;  %v883_v62 = vadd.f32 %v882_v50, %v881_v41  ;;  %v878_v22 = vadd.f32 %v877_v10, %v876_v58  ;;  %v1221_v39 = vunpack.c.l.b16 %v915_v27  ;;  %v2294_v10 = vld [vmem:[#allocation6 + $0x128] ss:$16 sps:$4 sm:$0xff]  }
 0x466   : > { %v893_v59 = vsel %vm857_vm10, %v854_v53, 0.0  ;;  %v1220_v44 = vunpack.c.l.b16 %v914_v35 }
 0x467   : > { %v889_v63 = vrot.slane %v888_v57, 2  ;;  %v842_v0 = vpop.permute.xlu0 %841  ;;  %v894_v4 = vrot.slane %v893_v59, 4  ;;  %v884_v13 = vrot.slane %v883_v62, 1  ;;  %v916_v33 = vpack.c.bf16 %v878_v22, %v878_v22  ;;  %v2318_v22 = vld [vmem:[#allocation6 + $0x1e0] ss:$16 sps:$4 sm:$0xff]  }
 0x468   : > { %v855_v21 = vmul.f32 %v2095_v55, %v842_v0  ;;  %v1228_v53 = vsel %vm584_vm2, %v1221_v39, %v1220_v44  ;;  %v2344_v39 = vld [vmem:[#allocation6 + $0x1ec] ss:$16 sps:$4 sm:$0xff]  }
 0x469   : > { %v890_v9 = vadd.f32 %v889_v63, %v888_v57  ;;  %v895_v11 = vadd.f32 %v894_v4, %v893_v59  ;;  %v885_v26 = vadd.f32 %v884_v13, %v883_v62  ;;  %v1222_v43 = vunpack.c.l.b16 %v916_v33  ;;  %v2306_v13 = vld [vmem:[#allocation6 + $0x168] ss:$16 sps:$4 sm:$0xff]   ;;  %v2341_v33 = vld [vmem:[#allocation6 + $0x18c] ss:$16 sps:$4 sm:$0xff]  }
 0x46a   : > { %v900_v12 = vsel %vm857_vm10, %v855_v21, 0.0  ;;  %v2288_v21 = vld [vmem:[#allocation6 + $0x108] ss:$16 sps:$4 sm:$0xff]   ;;  %2168 = vmatpush3.bf16.msra.mxu0 %v2341_v33 }
 0x46b   : > { %v901_v15 = vrot.slane %v900_v12, 4  ;;  %v847_v17 = vpop.permute.xlu0 %846  ;;  %v891_v49 = vrot.slane %v890_v9, 1  ;;  %v896_v18 = vrot.slane %v895_v11, 2  ;;  %v917_v36 = vpack.c.bf16 %v885_v26, %v885_v26  ;;  %v2324_v26 = vld [vmem:[#allocation6 + $0x220] ss:$16 sps:$4 sm:$0xff]   ;;  %2169 = vmatprep.subr.bf16.mxu0 %v2466_v7 }
 0x46c   : > { %v856_v19 = vmul.f32 %v2096_v5, %v847_v17  ;;  %v1229_v57 = vsel %vm586_vm3, %v1222_v43, %v1228_v53  ;;  %v2309_v17 = vld [vmem:[#allocation6 + $0x180] ss:$16 sps:$4 sm:$0xff]  }
 0x46d   : > { %v902_v54 = vadd.f32 %v901_v15, %v900_v12  ;;  %v897_v23 = vadd.f32 %v896_v18, %v895_v11  ;;  %v892_v3 = vadd.f32 %v891_v49, %v890_v9  ;;  %v1223_v45 = vunpack.c.l.b16 %v917_v36  ;;  %v2296_v9 = vld [vmem:[#allocation6 + $0x12c] ss:$16 sps:$4 sm:$0xff]   ;;  %v2300_v12 = vld [vmem:[#allocation6 + $0x148] ss:$16 sps:$4 sm:$0xff]   ;;  %v2311_v15 = vld [vmem:[#allocation6 + $0x184] ss:$16 sps:$4 sm:$0xff]  }
 0x46e   : > { %v907_v61 = vsel %vm857_vm10, %v856_v19, 0.0  ;;  %v2302_v11 = vld [vmem:[#allocation6 + $0x14c] ss:$16 sps:$4 sm:$0xff]   ;;  %v2314_v49 = vld [vmem:[#allocation6 + $0x1a4] ss:$16 sps:$4 sm:$0xff]  }
 0x46f   : > { %v903_v29 = vrot.slane %v902_v54, 2  ;;  %v908_v30 = vrot.slane %v907_v61, 4  ;;  %v898_v31 = vrot.slane %v897_v23, 1  ;;  %v918_v38 = vpack.c.bf16 %v892_v3, %v892_v3  ;;  %v2312_v18 = vld [vmem:[#allocation6 + $0x1a0] ss:$16 sps:$4 sm:$0xff]  }
 0x470   : > { %v1230_v59 = vsel %vm588_vm4, %v1223_v45, %v1229_v57  ;;  %v2317_v19 = vld [vmem:[#allocation6 + $0x1c4] ss:$16 sps:$4 sm:$0xff]   ;;  %v2331_v3 = vld [vmem:[#allocation6 + $0x260] ss:$16 sps:$4 sm:$0xff]   ;;  %v2342_v36 = vld [vmem:[#allocation6 + $0x1ac] ss:$16 sps:$4 sm:$0xff]  }
 0x471   : > { %v904_v32 = vadd.f32 %v903_v29, %v902_v54  ;;  %v909_v8 = vadd.f32 %v908_v30, %v907_v61  ;;  %v899_v34 = vadd.f32 %v898_v31, %v897_v23  ;;  %v1224_v52 = vunpack.c.l.b16 %v918_v38  ;;  %v2320_v54 = vld [vmem:[#allocation6 + $0x1e4] ss:$16 sps:$4 sm:$0xff]   ;;  %v2321_v61 = vld [vmem:[#allocation6 + $0x200] ss:$16 sps:$4 sm:$0xff]   ;;  %2170 = vmatpush3.bf16.msra.mxu0 %v2342_v36  ;;  %v2343_v38 = vld [vmem:[#allocation6 + $0x1cc] ss:$16 sps:$4 sm:$0xff]  }
 0x472   : > { %v2323_v23 = vld [vmem:[#allocation6 + $0x204] ss:$16 sps:$4 sm:$0xff]   ;;  %2171 = vmatprep.subr.bf16.mxu0 %v2466_v7  ;;  %v2042_v53 = vld [vmem:[%s2885_s7 + $0x2] ss:$8 sm:$0x7] }
 0x473   : > { %v905_v37 = vrot.slane %v904_v32, 1  ;;  %v910_v28 = vrot.slane %v909_v8, 2  ;;  %v919_v40 = vpack.c.bf16 %v899_v34, %v899_v34  ;;  %v1231_v62 = vsel %vm590_vm5, %v1224_v52, %v1230_v59  ;;  %v2329_v29 = vld [vmem:[#allocation6 + $0x244] ss:$16 sps:$4 sm:$0xff]  }
 0x474   : > { %v2333_v30 = vld [vmem:[#allocation6 + $0x264] ss:$16 sps:$4 sm:$0xff]   ;;  %v1464_v57 = vrot.slane %v2042_v53, %v2634_v25  ;;  %v1468_v59 = vrot.slane %v2042_v53, %v2696_v47  ;;  %vm1856_vm5 = vcmp.eq.s32.totalorder %v2576_v2, 2 }
 0x475   : > { %v906_v41 = vadd.f32 %v905_v37, %v904_v32  ;;  %v911_v42 = vadd.f32 %v910_v28, %v909_v8  ;;  %v1225_v55 = vunpack.c.l.b16 %v919_v40  ;;  %2172 = vmatpush3.bf16.msra.mxu0 %v2343_v38  ;;  %v2346_v40 = vld [vmem:[#allocation6 + $0x22c] ss:$16 sps:$4 sm:$0xff]  }
 0x476   : > { %2173 = vmatprep.subr.bf16.mxu0 %v2466_v7 }
 0x477   : > { %v920_v50 = vpack.c.bf16 %v906_v41, %v906_v41  ;;  %v912_v51 = vrot.slane %v911_v42, 1  ;;  %v1232_v63 = vsel %vm592_vm6, %v1225_v55, %v1231_v62  ;;  %v2347_v41 = vld [vmem:[#allocation6 + $0x24c] ss:$16 sps:$4 sm:$0xff]   ;;  %v2041_v55 = vld [vmem:[%s2885_s7 + $0x1] ss:$8 sm:$0x7] }
 0x479   : > { %v913_v56 = vadd.f32 %v912_v51, %v911_v42  ;;  %v1226_v58 = vunpack.c.l.b16 %v920_v50  ;;  %2174 = vmatpush3.bf16.msra.mxu0 %v2344_v39  ;;  %v2348_v42 = vld [vmem:[#allocation6 + $0x26c] ss:$16 sps:$4 sm:$0xff]  }
 0x47a   : > { %2175 = vmatprep.subr.bf16.mxu0 %v2466_v7 }
 0x47b   : > { %v921_v60 = vpack.c.bf16 %v913_v56, %v913_v56  ;;  %v1233_v4 = vsel %vm594_vm7, %v1226_v58, %v1232_v63  ;;  %v1445_v56 = vrot.slane %v2041_v55, %v2634_v25  ;;  %v1449_v58 = vrot.slane %v2041_v55, %v2696_v47 }
 0x47c   : > { %v1472_v25 = vrot.slane %v2042_v53, %v2699_v48  ;;  %v1453_v47 = vrot.slane %v2041_v55, %v2699_v48  ;;  %v1883_v53 = vstv %s1882_s27 }
 0x47d   : > { %v1227_v0 = vunpack.c.l.b16 %v921_v60  ;;  %v2187_v60 = vadd.f32 %v1464_v57, %v1445_v56  ;;  %v2189_v63 = vadd.f32 %v1468_v59, %v1449_v58  ;;  %v1891_v57 = vstv %s1890_s29 }
 0x47f   : > { %v1234_v5 = vsel %vm596_vm8, %v1227_v0, %v1233_v4  ;;  %vm1864_vm8 = vcmp.eq.s32.totalorder %v2576_v2, 3 }
 0x480   : > { %v1235_v6 = vpack.c.b16 %v1234_v5, %v1234_v5 }
 0x482   : > { %2039 = vmatmul.mubr.msk.bf16.vlgmr.msra.gmra.mrb[0].mxu1 %vm857_vm10, %v1235_v6 }
 0x483   : > { %1361 = vmatpush1.bf16.msra.mxu1 %v2288_v21  ;;  %1392 = vmatprep.mubr.bf16.mxu1 %v2469_v46 }
 0x484   : > { %1362 = vmatprep.subr.bf16.mxu1 %v2296_v9 }
 0x487   : > { %1363 = vmatpush1.bf16.msra.mxu1 %v2294_v10 }
 0x488   : > { %1364 = vmatprep.subr.bf16.mxu1 %v2302_v11 }
 0x48b   : > { %1365 = vmatpush1.bf16.msra.mxu1 %v2300_v12 }
 0x48c   : > { %1366 = vmatprep.subr.bf16.mxu1 %v2308_v14 }
 0x48f   : > { %1367 = vmatpush1.bf16.msra.mxu1 %v2306_v13 }
 0x490   : > { %1604 = vmatprep.subr.bf16.mxu1 %v2311_v15 }
 0x492   : > { %2040 = vmatmul.mubr.msk.bf16.vlgmr.msra.gmra.mrb[4].mxu1 %vm857_vm10, %v1235_v6 }
 0x493   : > { %1605 = vmatpush1.bf16.msra.mxu1 %v2309_v17  ;;  %1636 = vmatprep.mubr.bf16.mxu1 %v2469_v46  ;;  %v2327_v46 = vld [vmem:[#allocation6 + $0x240] ss:$16 sps:$4 sm:$0xff]  }
 0x494   : > { %1606 = vmatprep.subr.bf16.mxu1 %v2314_v49 }
 0x497   : > { %1607 = vmatpush1.bf16.msra.mxu1 %v2312_v18 }
 0x498   : > { %1608 = vmatprep.subr.bf16.mxu1 %v2317_v19 }
 0x49b   : > { %1609 = vmatpush1.bf16.msra.mxu1 %v2315_v20 }
 0x49c   : > { %1610 = vmatprep.subr.bf16.mxu1 %v2320_v54 }
 0x49f   : > { %1611 = vmatpush1.bf16.msra.mxu1 %v2318_v22 }
 0x4a0   : > { %1612 = vmatprep.subr.bf16.mxu1 %v2323_v23 }
 0x4a3   : > { %1613 = vmatpush1.bf16.msra.mxu1 %v2321_v61  ;;  %v2393_v61 = vld [vmem:[%s2887_s9] sm:$0xff] }
 0x4a4   : > { %1614 = vmatprep.subr.bf16.mxu1 %v2326_v24 }
 0x4a7   : > { %1615 = vmatpush1.bf16.msra.mxu1 %v2324_v26 }
 0x4a8   : > { %1616 = vmatprep.subr.bf16.mxu1 %v2329_v29 }
 0x4ab   : > { %1617 = vmatpush1.bf16.msra.mxu1 %v2327_v46  ;;  %v1437_v46 = vld [vmem:[%s2885_s7 + $0x3] ss:$0 sm:$0xff] }
 0x4ac   : > { %1618 = vmatprep.subr.bf16.mxu1 %v2333_v30 }
 0x4af   : > { %1619 = vmatpush1.bf16.msra.mxu1 %v2331_v3 }
 0x4b2   : > { %1637 = vmatmul.mubr.bf16.vlgmr.msra.gmra.mrb[0].mxu1 %v2629_v16  ;;  %v2345_v16 = vld [vmem:[#allocation6 + $0x20c] ss:$16 sps:$4 sm:$0xff]  }
 0x4b3   : > { %2176 = vmatpush3.bf16.msra.mxu0 %v2345_v16  ;;  %v1843_v16 = vstv %s1842_s17 }
 0x4b4   : > { %2177 = vmatprep.subr.bf16.mxu0 %v2466_v7  ;;  %vm1844_vm0 = vcmp.eq.s32.totalorder %v2574_v1, %v1843_v16 }
 0x4b5   : > { %vm1845_vm3 = vmand %vm1840_vm15, %vm1844_vm0  ;;  %vm1884_vm15 = vcmp.eq.s32.totalorder %v2574_v1, %v1883_v53 }
 0x4b7   : > { %2178 = vmatpush3.bf16.msra.mxu0 %v2346_v40 }
 0x4b8   : > { %2179 = vmatprep.subr.bf16.mxu0 %v2466_v7 }
 0x4bb   : > { %2180 = vmatpush3.bf16.msra.mxu0 %v2347_v41  ;;  %v1859_v41 = vstv %s1858_s21 }
 0x4bc   : > { %2181 = vmatprep.subr.bf16.mxu0 %v2466_v7  ;;  %vm1860_vm6 = vcmp.eq.s32.totalorder %v2574_v1, %v1859_v41 }
 0x4bd   : > { %vm1861_vm7 = vmand %vm1856_vm5, %vm1860_vm6 }
 0x4bf   : > { %2182 = vmatpush3.bf16.msra.mxu0 %v2348_v42  ;;  %v1867_v42 = vstv %s1866_s23 }
 0x4c0   : > { %vm1868_vm9 = vcmp.eq.s32.totalorder %v2574_v1, %v1867_v42 }
 0x4c1   : > { %vm1869_vm10 = vmand %vm1864_vm8, %vm1868_vm9 }
 0x4c2   : > { %v1870_v55 = vsel %vm1869_vm10, 1.0, %v2466_v7 }
 0x4c4   : > { %v1189_v31 = vpop.f32.mrb[4].mxu0 }
 0x4c5   : > { %v1191_v27 = vpop.f32.mrb[5].mxu0 }
 0x4c6   : > { %v1193_v32 = vpop.f32.mrb[6].mxu0 }
 0x4c7   : > { %v1194_v8 = vpop.f32.mrb[7].mxu0 }
 0x4e4   : > { %v1679_v34 = vpop.f32.mrb[8].mxu0 }
 0x4e5   : > { %v2165_v35 = vpop.f32.mrb[9].mxu0  ;;  %v1680_v15 = vadd.f32 %v1679_v34, %v1472_v25  ;;  %v1911_v25 = vstv %s1910_s13 }
 0x4e6   : > { %v1682_v37 = vpop.f32.mrb[10].mxu0 }
 0x4e7   : > { %v2166_v28 = vpop.f32.mrb[11].mxu0 }
 0x565   : > { %v1394_v43 = vpop.f32.mrb[4].mxu1 }
 0x566   : > { %v1440_v44 = vadd.f32 %v1394_v43, %v1189_v31  ;;  %v1396_v45 = vpop.f32.mrb[5].mxu1  ;;  %v1846_v43 = vsel %vm1845_vm3, 1.0, %v2466_v7 }
 0x567   : > { %v1706_v50 = vadd.f32 %v1396_v45, %v1191_v27  ;;  %v1398_v51 = vpop.f32.mrb[6].mxu1 }
 0x568   : > { %v1399_v52 = vpop.f32.mrb[7].mxu1  ;;  %v1459_v49 = vadd.f32 %v1453_v47, %v1440_v44  ;;  %v1862_v51 = vsel %vm1861_vm7, 1.0, %v2466_v7 }
 0x585   : > { %v1638_v62 = vpop.f32.mrb[0].mxu1 }
 0x586   : > { %v2188_v0 = vadd.f32 %v2187_v60, %v1638_v62  ;;  %v1640_v4 = vpop.f32.mrb[1].mxu1  ;;  %v1899_v60 = vstv %s1898_s11 }
 0x587   : > { %v1642_v21 = vpop.f32.mrb[2].mxu1  ;;  %v2190_v9 = vadd.f32 %v2189_v63, %v1640_v4  ;;  %vm1900_vm5 = vcmp.eq.s32.totalorder %v2574_v1, %v1899_v60 }
 0x588   : > { %v2067_v5 = vmul.f32 -1.442695, %v2188_v0  ;;  %v1643_v6 = vpop.f32.mrb[3].mxu1 }
 0x589   : > { %v2068_v10 = vmul.f32 -1.442695, %v2190_v9 }
 0x58a   : > { %2383 = vpow2.f32 %v2067_v5 }
 0x58b   : > { %2385 = vpow2.f32 %v2068_v10 }
 0x594   : > { %v2384_v11 = vpop.eup %2383 }
 0x595   : > { %v1689_v12 = vadd.f32 1.0, %v2384_v11  ;;  %v2386_v14 = vpop.eup %2385 }
 0x596   : > { %v1696_v13 = vadd.f32 1.0, %v2386_v14 }
 0x597   : > { %2387 = vrcp.f32 %v1689_v12  ;;  %v1908_v12 = vstv %s1907_s12 }
 0x598   : > { %2389 = vrcp.f32 %v1696_v13 }
 0x5a1   : > { %v2388_v17 = vpop.eup %2387 }
 0x5a2   : > { %v1699_v18 = vmul.f32 %v2388_v17, %v1680_v15  ;;  %v2390_v20 = vpop.eup %2389 }
 0x5a3   : > { %v1702_v54 = vsub.f32 1.0, %v2390_v20  ;;  %v1704_v24 = vmul.f32 %v2393_v61, %v2390_v20 }
 0x5a4   : > { %v1700_v19 = vadd.f32 %v1699_v18, %v1459_v49 }
 0x5a6   : > { %2391 = vtanh.f32 %v1700_v19 }
 0x5b0   : > { %v2392_v22 = vpop.eup %2391 }
 0x5b1   : > { %v1703_v23 = vmul.f32 %v2392_v22, %v1702_v54 }
 0x5b3   : > { %v1705_v26 = vadd.f32 %v1704_v24, %v1703_v23 }
 0x5b5   : > { %v1707_v48 = vpack.c.bf16 %v1705_v26, %v1705_v26  ;;  %1815 = vst [vmem:[%s2887_s9] sm:$0xff] %v1705_v26 }
 0x5b7   : > { %2184 = vmatmul.mubr.bf16.vlgmr.msra.gmra.mrb[12].mxu0 %v1707_v48 }
 0x68a   : > { %v1806_v29 = vpop.f32.mrb[12].mxu0 }
 0x68b   : > { %v1812_v30 = vadd.f32 %v1806_v29, %v1706_v50  ;;  %v2185_v3 = vpop.f32.mrb[13].mxu0  ;;  %v1875_v50 = vstv %s1874_s25 }
 0x68c   : > { %v1809_v31 = vpop.f32.mrb[14].mxu0 }
 0x68d   : > { %v2186_v27 = vpop.f32.mrb[15].mxu0  ;;  %v1813_v32 = vadd.f32 %v1812_v30, %v1437_v46 }
 0x68f   : > { %v1817_v8 = vsel %vm1816_vm11, %v1813_v32, -1e+30  ;;  %1814 = vst [vmem:[%s2581_s0] sm:$0xff] %v1813_v32  ;;  %s1849_s0 = sadd.s32 1, %s2838_s16 }
 0x690   : > { %1818 = vmax.xlane.f32.xlu1 %v1817_v8  ;;  %s1850_s19 = sld [smem:[#allocation4 + %s1849_s0]] }
 0x696   : > { %v1851_v40 = vstv %s1850_s19 }
 0x697   : > { %vm1852_vm2 = vcmp.eq.s32.totalorder %v2574_v1, %v1851_v40 }
 0x698   : > { %vm1853_vm4 = vmand %vm1848_vm1, %vm1852_vm2  ;;  %vm1888_vm1 = vcmp.eq.s32.totalorder %v2576_v2, 6  ;;  %vm1892_vm2 = vcmp.eq.s32.totalorder %v2574_v1, %v1891_v57 }
 0x699   : > { %v1854_v44 = vsel %vm1853_vm4, 1.0, %v2466_v7  ;;  %vm1893_vm3 = vmand %vm1888_vm1, %vm1892_vm2  ;;  %vm1896_vm4 = vcmp.eq.s32.totalorder %v2576_v2, 7 }
 0x69a   : > { %v1855_v45 = vadd.f32 %v1854_v44, %v1846_v43  ;;  %v1894_v0 = vsel %vm1893_vm3, 1.0, %v2466_v7  ;;  %vm1901_vm6 = vmand %vm1896_vm4, %vm1900_vm5 }
 0x69b   : > { %v1902_v5 = vsel %vm1901_vm6, 1.0, %v2466_v7 }
 0x69c   : > { %v1863_v52 = vadd.f32 %v1862_v51, %v1855_v45 }
 0x69e   : > { %v1871_v56 = vadd.f32 %v1870_v55, %v1863_v52 }
 0x71d   : > { %v1819_v33 = vpop.xlane.xlu1 %1818 }
 0x71e   : > { %vm1820_vm12 = vcmp.eq.f32.partialorder %v1817_v8, %v1819_v33 }
 0x71f   : > { %vm1821_vm13 = vmand %vm1820_vm12, %vm1816_vm11  ;;  %vm1872_vm11 = vcmp.eq.s32.totalorder %v2576_v2, 4  ;;  %vm1876_vm12 = vcmp.eq.s32.totalorder %v2574_v1, %v1875_v50 }
 0x720   : > { %v1822_v34 = vsel %vm1821_vm13, %v2574_v1, 128  ;;  %vm1877_vm13 = vmand %vm1872_vm11, %vm1876_vm12 }
 0x721   : > { %v1824_v35 = vshra.s32 %v1822_v34, 16  ;;  %v1823_v37 = vand.u32 65535, %v1822_v34  ;;  %v1878_v58 = vsel %vm1877_vm13, 1.0, %v2466_v7 }
 0x722   : > { %v1879_v59 = vadd.f32 %v1878_v58, %v1871_v56 }
 0x723   : > { %v1826_v36 = vcvt.s32.f32 %v1824_v35  ;;  %v1825_v38 = vcvt.s32.f32 %v1823_v37 }
 0x725   : > { %1827 = vmin.xlane.f32.xlu0 %v1826_v36 }
 0x7b2   : > { %v2834_v28 = vpop.xlane.xlu0 %1827 }
 0x7b3   : > { %vm1829_vm14 = vcmp.eq.f32.partialorder %v1826_v36, %v2834_v28  ;;  %v1834_v4 = vcvt.f32.s32 %v2834_v28 }
 0x7b4   : > { %v1830_v39 = vsel %vm1829_vm14, %v1825_v38, inf  ;;  %vm1880_vm14 = vcmp.eq.s32.totalorder %v2576_v2, 5 }
 0x7b5   : > { %1831 = vmin.xlane.f32.xlu1 %v1830_v39  ;;  %vm1885_vm0 = vmand %vm1880_vm14, %vm1884_vm15  ;;  %v1835_v9 = vshll.u32 %v1834_v4, 16 }
 0x7b6   : > { %v1886_v62 = vsel %vm1885_vm0, 1.0, %v2466_v7 }
 0x7b7   : > { %v1887_v63 = vadd.f32 %v1886_v62, %v1879_v59 }
 0x7b9   : > { %v1895_v21 = vadd.f32 %v1894_v0, %v1887_v63 }
 0x7bb   : > { %v1903_v10 = vadd.f32 %v1902_v5, %v1895_v21 }
 0x7bd   : > { %v1909_v14 = vmul.f32 %v1908_v12, %v1903_v10 }
 0x842   : > { %v1832_v6 = vpop.xlane.xlu1 %1831 }
 0x843   : > { %v1833_v11 = vcvt.f32.s32 %v1832_v6 }
 0x845   : > { %v1836_v2 = vadd.s32 %v1835_v9, %v1833_v11 }
 0x847   : > { %vm1837_vm7 = vcmp.eq.s32.totalorder %v2574_v1, %v1836_v2 }
 0x848   : > { %v2077_v47 = vsel %vm1837_vm7, 1.0, %v2466_v7 }
 0x849   : > { %v1912_v13 = vmul.f32 %v2077_v47, %v1911_v25 }
 0x84b   : > { %v1913_v15 = vadd.f32 %v1912_v13, %v1909_v14 }
 0x84d   : > { %1914 = vst [vmem:[#allocation2] sm:$0xff] %v1913_v15 }
 0x84e PF: > { %s31_s1 = sadd.s32 1, %s2458_s1  }
 0x84f   : > { %p28_p2 = scmp.ge.s32.totalorder %s31_s1, 8  }
 0x851   :  { %30 = sbr.rel (!%p28_p2) target bundleno = 26 (0x1a), region = 90 }
 0x858   :  { %1940 = vsyncpa [#allocation7], 1 }
 0x859   :  { %1942 = vsyncpa [#allocation7 + $0x1], 1 }

</bundles_post_ra>
